<compile_context>
chip_gen: v7x
topology: tpu7x:2x2x1
jax: 0.10.0
libtpu: 0.0.40
codegen_flags: <defaults>
</compile_context>

<pallas_src>
import jax
import jax.numpy as jnp
from jax import lax
from jax.experimental import pallas as pl
from jax.experimental.pallas import tpu as pltpu

BN_EPS = 1e-5


def _round_up(v, m):
    return (v + m - 1) // m * m


# ---------------------------------------------------------------------------
# Pallas kernels
# ---------------------------------------------------------------------------
def _conv3x3_bn_relu_kernel(x_ref, w_ref, b_ref, o_ref, acc_ref):
    """Fused 3x3 conv (9 shifted MXU matmuls) + folded-BN bias + ReLU.

    Grid = (N, row_tiles, K_tiles); K is innermost and "arbitrary".

    x_ref  : (1, 1, (TH+2)*Wp, TK) bf16  row tile of the zero-padded input,
             flattened h-major over the padded width Wp (Wp % 16 == 0, so every
             kh slab below starts on a bf16 sublane-tile boundary -> no retile).
    w_ref  : (9, TK, Coutp) bf16  tap-major weight slice, BN scale folded in.
    b_ref  : (1, Coutp) f32       folded BN bias.
    o_ref  : (1, 1, TH*Wp, Coutp) f32  output rows (halo cols discarded on host).
    acc_ref: (3, TH*Wp, Coutp) f32 VMEM accumulator, one plane per kw so the kw
             shift (XLU rotate) runs once in the epilogue, not per K step.
    """
    k = pl.program_id(2)

    @pl.when(k == 0)
    def _init():
        acc_ref[...] = jnp.zeros_like(acc_ref)

    m = o_ref.shape[2]                 # TH * Wp output rows per tile
    wp = (x_ref.shape[2] - m) // 2     # padded width (2 halo rows of wp each)

    for kw in range(3):                # fully unrolled at trace time
        part = None
        for kh in range(3):
            slab = x_ref[0, 0, kh * wp:kh * wp + m, :]   # aligned, contiguous rows
            tap = jnp.dot(slab, w_ref[3 * kh + kw],
                          preferred_element_type=jnp.float32)
            part = tap if part is None else part + tap
        acc_ref[kw] += part

    @pl.when(k == pl.num_programs(2) - 1)
    def _finalize():
        acc = acc_ref[0]
        for kw in (1, 2):
            # kw shift as one sublane rotate (XLU slot); wrapped rows land only in
            # the halo columns (c >= W) that the host slices away.
            acc = acc + pltpu.roll(acc_ref[kw], m - kw, axis=0)
        o_ref[0, 0] = jnp.maximum(acc + b_ref[...], 0.0).astype(o_ref.dtype)


def _stage_1x1_bn_relu_kernel(x_ref, w_ref, b_ref, o_ref):
    """Fused 1x1 conv + folded-BN bias + ReLU for ALL pyramid bins (grid over bins)."""
    acc = jnp.dot(x_ref[0], w_ref[0], preferred_element_type=jnp.float32)
    o_ref[0] = jnp.maximum(acc + b_ref[0], 0.0).astype(o_ref.dtype)


# ---------------------------------------------------------------------------
# Pallas wrappers
# ---------------------------------------------------------------------------
def _fused_conv3x3_bn_relu(x_nhwc_bf16, w_khkwcico, bias):
    """x (N,H,W,Cin) bf16; w (3,3,Cin,Cout) f32 (BN scale folded); bias (Cout,) f32."""
    n, h, w, cin = x_nhwc_bf16.shape
    cout = w_khkwcico.shape[-1]

    wp = _round_up(w + 2, 16)                 # bf16 packs 2 rows/sublane
    th = max(1, min(h, max(1, 256 // wp)))    # ~256 output rows per tile (MXU M)
    r = -(-h // th)
    cpad = _round_up(cin, 128)
    coutp = _round_up(cout, 128)              # lane-dense (unmasked) output stores
    tk = 512 if cpad % 512 == 0 else (256 if cpad % 256 == 0 else 128)
    kt = cpad // tk
    pr = (th + 2) * wp
    m = th * wp

    # Halo pad (top 1, bottom >=1, left 1, right up to Wp) + channel pad, then
    # restructure into per-row-tile slabs (only 2 duplicated halo rows per tile).
    xp = jnp.pad(x_nhwc_bf16,
                 ((0, 0), (1, r * th + 1 - h), (1, wp - w - 1), (0, cpad - cin)))
    x_tiles = jnp.stack([xp[:, i * th:i * th + th + 2] for i in range(r)], axis=1)
    x_flat = x_tiles.reshape(n, r, pr, cpad)

    w_flat = jnp.pad(w_khkwcico.reshape(9, cin, cout),
                     ((0, 0), (0, cpad - cin), (0, coutp - cout))).astype(jnp.bfloat16)
    b_row = jnp.pad(bias, (0, coutp - cout)).reshape(1, coutp).astype(jnp.float32)

    if kt == 1:
        # Constant operand: one resident, un-pipelined VMEM copy (no double buffer).
        w_spec = pl.BlockSpec(memory_space=pltpu.MemorySpace.VMEM)
    else:
        # K-tiled weight: residency bounded to one (9, TK, Coutp) slice per step.
        w_spec = pl.BlockSpec((9, tk, coutp), lambda nn, i, k: (0, k, 0))
    b_spec = pl.BlockSpec(memory_space=pltpu.MemorySpace.VMEM)

    vmem_est = (2 * pr * tk * 2            # double-buffered bf16 input tile
                + 2 * 9 * tk * coutp * 2   # weight slice(s)
                + 3 * m * coutp * 4        # f32 accumulator planes
                + 2 * m * coutp * 4)       # double-buffered f32 output tile
    out = pl.pallas_call(
        _conv3x3_bn_relu_kernel,
        out_shape=jax.ShapeDtypeStruct((n, r, m, coutp), jnp.float32),
        grid_spec=pltpu.PrefetchScalarGridSpec(
            num_scalar_prefetch=0,
            grid=(n, r, kt),
            in_specs=[pl.BlockSpec((1, 1, pr, tk), lambda nn, i, k: (nn, i, 0, k)),
                      w_spec, b_spec],
            out_specs=pl.BlockSpec((1, 1, m, coutp), lambda nn, i, k: (nn, i, 0, 0)),
            scratch_shapes=[pltpu.VMEM((3, m, coutp), jnp.float32)]),
        compiler_params=pltpu.CompilerParams(
            dimension_semantics=("parallel", "parallel", "arbitrary"),
            # Explicit scoped-VMEM budget; stays under v7x's 64 MiB physical cap.
            vmem_limit_bytes=int(min(max(4 * vmem_est, 32 << 20), 64 << 20))),
    )(x_flat, w_flat, b_row)

    out = out.reshape(n, r, th, wp, coutp)[:, :, :, :w, :cout]
    return out.reshape(n, r * th, w, cout)[:, :h]


def _fused_stage_convs(pooled_list, w_list, scale_list, bias_list, cout):
    """All per-bin 1x1 conv + BN + ReLU stages in ONE pallas_call."""
    nb = len(pooled_list)
    cin = pooled_list[0].shape[-1]
    cin_p = _round_up(cin, 128)
    cout_p = _round_up(cout, 128)
    rp = _round_up(max(p.shape[0] * p.shape[1] * p.shape[2] for p in pooled_list), 128)

    xs, ws, bs_ = [], [], []
    for p, wt, sc, bi in zip(pooled_list, w_list, scale_list, bias_list):
        rows = p.reshape(-1, cin)
        rows = jnp.pad(rows, ((0, rp - rows.shape[0]), (0, cin_p - cin)))
        xs.append(rows.astype(jnp.bfloat16))
        wm = wt.reshape(cout, cin).T * sc[None, :]
        ws.append(jnp.pad(wm, ((0, cin_p - cin), (0, cout_p - cout))).astype(jnp.bfloat16))
        bs_.append(jnp.pad(bi, (0, cout_p - cout)).reshape(1, cout_p))
    x_stk = jnp.stack(xs)                        # (NB, RP, Cin_p)     bf16
    w_stk = jnp.stack(ws)                        # (NB, Cin_p, Cout_p) bf16
    b_stk = jnp.stack(bs_).astype(jnp.float32)   # (NB, 1, Cout_p)     f32

    return pl.pallas_call(
        _stage_1x1_bn_relu_kernel,
        out_shape=jax.ShapeDtypeStruct((nb, rp, cout_p), jnp.float32),
        grid_spec=pltpu.PrefetchScalarGridSpec(
            num_scalar_prefetch=0,
            grid=(nb,),
            in_specs=[pl.BlockSpec((1, rp, cin_p), lambda i: (i, 0, 0)),
                      pl.BlockSpec((1, cin_p, cout_p), lambda i: (i, 0, 0)),
                      pl.BlockSpec((1, 1, cout_p), lambda i: (i, 0, 0))],
            out_specs=pl.BlockSpec((1, rp, cout_p), lambda i: (i, 0, 0))),
        compiler_params=pltpu.CompilerParams(dimension_semantics=("parallel",)),
    )(x_stk, w_stk, b_stk)


# ---------------------------------------------------------------------------
# Plain-JAX glue: BN folding, adaptive avg pool, bilinear upsample
# ---------------------------------------------------------------------------
def _fold_bn(gamma, beta, mean, var):
    scale = gamma * lax.rsqrt(var + BN_EPS)
    return scale, beta - mean * scale


def _pool_bounds(size, out):
    starts = [(i * size) // out for i in range(out)]
    ends = [-((-(i + 1) * size) // out) for i in range(out)]
    return starts, ends


def _adaptive_avg_pool_all_nhwc(x, bin_sizes):
    """PyTorch AdaptiveAvgPool2d for EVERY bin size with one pass over x.

    A 2-D prefix sum (integral image) is computed once; each bin is then a
    4-corner gather, so the feature map is read once instead of once per bin.
    """
    # TODO(synk): resampling glue kept in plain JAX (tiny vs. the bottleneck conv).
    n_, h, w, c = x.shape
    s = jnp.cumsum(jnp.cumsum(x, axis=1), axis=2)
    s = jnp.pad(s, ((0, 0), (1, 0), (1, 0), (0, 0)))           # (N, H+1, W+1, C)
    pooled = []
    for bs in bin_sizes:
        r0l, r1l = _pool_bounds(h, bs)
        c0l, c1l = _pool_bounds(w, bs)
        r0, r1 = jnp.array(r0l), jnp.array(r1l)
        c0, c1 = jnp.array(c0l), jnp.array(c1l)
        area = ((r1 - r0)[:, None] * (c1 - c0)[None, :]).astype(jnp.float32)
        s_r1, s_r0 = s[:, r1], s[:, r0]                        # (N, bs, W+1, C)
        tot = (s_r1[:, :, c1] - s_r1[:, :, c0]
               - s_r0[:, :, c1] + s_r0[:, :, c0])              # (N, bs, bs, C)
        pooled.append(tot / area[None, :, :, None])
    return pooled


def _adaptive_avg_pool_direct_nhwc(x, out_size):
    """Direct slice+mean AdaptiveAvgPool2d (reference path only)."""
    n_, h, w, c = x.shape
    rs, re = _pool_bounds(h, out_size)
    cs, ce = _pool_bounds(w, out_size)
    out_rows = []
    for r0, r1 in zip(rs, re):
        cells = [jnp.mean(x[:, r0:r1, c0:c1, :], axis=(1, 2))
                 for c0, c1 in zip(cs, ce)]
        out_rows.append(jnp.stack(cells, axis=1))
    return jnp.stack(out_rows, axis=1)


def _bilinear_upsample_nhwc(x, out_h, out_w):
    """F.interpolate(mode='bilinear', align_corners=True), NHWC input."""
    # TODO(synk): resampling kept in plain JAX (gather + lerp).
    n_, in_h, in_w, c = x.shape

    def src_coords(out_size, in_size):
        if out_size == 1 or in_size == 1:
            return jnp.zeros((out_size,), jnp.float32)
        return jnp.arange(out_size, dtype=jnp.float32) * (
            (in_size - 1) / (out_size - 1))

    ys = src_coords(out_h, in_h)
    xs = src_coords(out_w, in_w)
    y0 = jnp.clip(jnp.floor(ys).astype(jnp.int32), 0, in_h - 1)
    y1 = jnp.clip(y0 + 1, 0, in_h - 1)
    wy = (ys - y0.astype(jnp.float32))[None, :, None, None]
    x0 = jnp.clip(jnp.floor(xs).astype(jnp.int32), 0, in_w - 1)
    x1 = jnp.clip(x0 + 1, 0, in_w - 1)
    wx = (xs - x0.astype(jnp.float32))[None, None, :, None]

    top = x[:, y0]
    bot = x[:, y1]
    rows = top * (1.0 - wy) + bot * wy
    left = rows[:, :, x0]
    right = rows[:, :, x1]
    return left * (1.0 - wx) + right * wx


# ---------------------------------------------------------------------------
# _PSPModule.forward
# ---------------------------------------------------------------------------
def psp_module_forward(x_nchw, params, bin_sizes):
    """Pallas implementation of _PSPModule.forward (eval-mode BN, eval dropout)."""
    n, c, h, w = x_nchw.shape
    cout = params["stage_w"][0].shape[0]
    x_nhwc = jnp.transpose(x_nchw, (0, 2, 3, 1)).astype(jnp.float32)

    # Pyramid stages: one-pass pooling for all bins + one batched 1x1 conv kernel.
    pooled = _adaptive_avg_pool_all_nhwc(x_nhwc, bin_sizes)
    scales, biases = [], []
    for i in range(len(bin_sizes)):
        s_, b_ = _fold_bn(params["stage_g"][i], params["stage_b"][i],
                          params["stage_m"][i], params["stage_v"][i])
        scales.append(s_)
        biases.append(b_)
    stage_rows = _fused_stage_convs(pooled, params["stage_w"], scales, biases, cout)

    # Upsample each stage output and concatenate in bf16 (halves the HBM round
    # trip feeding the bottleneck conv vs an f32 concat + f32 pad).
    branches = [x_nhwc.astype(jnp.bfloat16)]
    for i, bs in enumerate(bin_sizes):
        y = stage_rows[i, :n * bs * bs, :cout].reshape(n, bs, bs, cout)
        branches.append(_bilinear_upsample_nhwc(y, h, w).astype(jnp.bfloat16))
    cat = jnp.concatenate(branches, axis=-1)                    # (N, H, W, Ctot) bf16

    sc, bi = _fold_bn(params["bott_g"], params["bott_b"],
                      params["bott_m"], params["bott_v"])
    # (Cout, Ctot, 3, 3) -> (kh, kw, cin, cout), BN scale folded into cout columns.
    w_conv = jnp.transpose(params["bott_w"], (2, 3, 1, 0)) * sc[None, None, None, :]
    out_nhwc = _fused_conv3x3_bn_relu(cat, w_conv, bi)

    # Dropout2d(p=0.1): inference/eval mode -> identity.
    return jnp.transpose(out_nhwc, (0, 3, 1, 2))


# ---------------------------------------------------------------------------
# Pure-JAX reference (module semantics, f32 everywhere)
# ---------------------------------------------------------------------------
def _ref_forward(x_nchw, params, bin_sizes):
    dn = ("NCHW", "OIHW", "NCHW")

    def bn(t, g, b, m_, v):
        g, b, m_, v = (u.reshape(1, -1, 1, 1) for u in (g, b, m_, v))
        return (t - m_) * g * lax.rsqrt(v + BN_EPS) + b

    n, c, h, w = x_nchw.shape
    x_nhwc = jnp.transpose(x_nchw, (0, 2, 3, 1))
    pyramids = [x_nchw]
    for i, bs in enumerate(bin_sizes):
        pooled = _adaptive_avg_pool_direct_nhwc(x_nhwc, bs)
        pooled_nchw = jnp.transpose(pooled, (0, 3, 1, 2))
        y = lax.conv_general_dilated(pooled_nchw, params["stage_w"][i],
                                     (1, 1), [(0, 0), (0, 0)],
                                     dimension_numbers=dn)
        y = jnp.maximum(bn(y, params["stage_g"][i], params["stage_b"][i],
                           params["stage_m"][i], params["stage_v"][i]), 0.0)
        y_up = _bilinear_upsample_nhwc(jnp.transpose(y, (0, 2, 3, 1)), h, w)
        pyramids.append(jnp.transpose(y_up, (0, 3, 1, 2)))

    cat = jnp.concatenate(pyramids, axis=1)
    out = lax.conv_general_dilated(cat, params["bott_w"], (1, 1),
                                   [(1, 1), (1, 1)], dimension_numbers=dn)
    out = jnp.maximum(bn(out, params["bott_g"], params["bott_b"],
                         params["bott_m"], params["bott_v"]), 0.0)
    return out  # Dropout2d eval-mode: identity


# ---------------------------------------------------------------------------
if __name__ == "__main__":
    key = jax.random.PRNGKey(0)
    N, in_channels, H, W = 2, 32, 16, 16
    bin_sizes = (1, 2, 3, 6)
    out_channels = in_channels // len(bin_sizes)                # 8
    cat_channels = in_channels + out_channels * len(bin_sizes)  # 64

    keys = iter(jax.random.split(key, 64))

    def nrm(shape, s=1.0):
        return s * jax.random.normal(next(keys), shape, jnp.float32)

    params = {
        "stage_w": [nrm((out_channels, in_channels, 1, 1), 0.1) for _ in bin_sizes],
        "stage_g": [1.0 + 0.1 * nrm((out_channels,)) for _ in bin_sizes],
        "stage_b": [0.1 * nrm((out_channels,)) for _ in bin_sizes],
        "stage_m": [0.1 * nrm((out_channels,)) for _ in bin_sizes],
        "stage_v": [0.5 + jnp.abs(nrm((out_channels,))) for _ in bin_sizes],
        "bott_w": nrm((out_channels, cat_channels, 3, 3), 0.05),
        "bott_g": 1.0 + 0.1 * nrm((out_channels,)),
        "bott_b": 0.1 * nrm((out_channels,)),
        "bott_m": 0.1 * nrm((out_channels,)),
        "bott_v": 0.5 + jnp.abs(nrm((out_channels,))),
    }
    x = nrm((N, in_channels, H, W))

    fwd = jax.jit(psp_module_forward, static_argnums=2)
    out = jax.block_until_ready(fwd(x, params, bin_sizes))

    ref = jax.block_until_ready(_ref_forward(x, params, bin_sizes))
    assert out.shape == ref.shape == (N, out_channels, H, W)
    max_err = jnp.max(jnp.abs(out - ref))
    # bf16 MXU operands in the fused convs -> loose tolerance vs the f32 reference.
    assert jnp.allclose(out, ref, atol=3e-2, rtol=3e-2), f"mismatch: {max_err}"

    print("KERNEL_OK")
</pallas_src>

<mosaic_0001>
module attributes {stable_mosaic.version = 11 : i64} {
  func.func @_stage_1x1_bn_relu_kernel(%arg0: i32, %arg1: memref<1x128x128xbf16, #tpu.memory_space<vmem>>, %arg2: memref<1x128x128xbf16, #tpu.memory_space<vmem>>, %arg3: memref<1x1x128xf32, #tpu.memory_space<vmem>>, %arg4: memref<1x128x128xf32, #tpu.memory_space<vmem>>) attributes {dimension_semantics = [#tpu.dimension_semantics<parallel>], iteration_bounds = array<i64: 4>, scalar_prefetch = 0 : i64, scratch_operands = 0 : i64, tpu.core_type = #tpu.core_type<tc>, window_params = [{transform_indices = @transform_0, window_bounds = array<i64: 1, 128, 128>}, {transform_indices = @transform_1, window_bounds = array<i64: 1, 128, 128>}, {transform_indices = @transform_2, window_bounds = array<i64: 1, 1, 128>}, {transform_indices = @transform_3, window_bounds = array<i64: 1, 128, 128>}]} {
    %c0 = arith.constant 0 : index
    %c0_0 = arith.constant 0 : index
    %c0_1 = arith.constant 0 : index
    %0 = vector.load %arg1[%c0, %c0_0, %c0_1] : memref<1x128x128xbf16, #tpu.memory_space<vmem>>, vector<1x128x128xbf16>
    %1 = vector.shape_cast %0 : vector<1x128x128xbf16> to vector<128x128xbf16>
    %c0_2 = arith.constant 0 : index
    %c0_3 = arith.constant 0 : index
    %c0_4 = arith.constant 0 : index
    %2 = vector.load %arg2[%c0_2, %c0_3, %c0_4] : memref<1x128x128xbf16, #tpu.memory_space<vmem>>, vector<1x128x128xbf16>
    %3 = vector.shape_cast %2 : vector<1x128x128xbf16> to vector<128x128xbf16>
    %cst = arith.constant dense<0.000000e+00> : vector<128x128xf32>
    %4 = tpu.matmul %1, %3, %cst {dimension_numbers = #tpu.dot_dimension_numbers<[1], [0], [0], [1], [0, 0, 1, 1], [], []>} : vector<128x128xbf16>, vector<128x128xbf16>, vector<128x128xf32> -> vector<128x128xf32>
    %c0_5 = arith.constant 0 : index
    %c0_6 = arith.constant 0 : index
    %c0_7 = arith.constant 0 : index
    %5 = vector.load %arg3[%c0_5, %c0_6, %c0_7] : memref<1x1x128xf32, #tpu.memory_space<vmem>>, vector<1x1x128xf32>
    %6 = vector.shape_cast %5 : vector<1x1x128xf32> to vector<1x128xf32>
    %7 = vector.broadcast %6 : vector<1x128xf32> to vector<128x128xf32>
    %8 = arith.addf %4, %7 : vector<128x128xf32>
    %cst_8 = arith.constant 0.000000e+00 : f32
    %9 = vector.broadcast %cst_8 : f32 to vector<128x128xf32>
    %10 = arith.maximumf %8, %9 : vector<128x128xf32>
    %c0_9 = arith.constant 0 : index
    %c0_10 = arith.constant 0 : index
    %c0_11 = arith.constant 0 : index
    %11 = vector.load %arg4[%c0_9, %c0_10, %c0_11] : memref<1x128x128xf32, #tpu.memory_space<vmem>>, vector<1x128x128xf32>
    %12 = vector.shape_cast %11 : vector<1x128x128xf32> to vector<128x128xf32>
    %13 = vector.shape_cast %10 : vector<128x128xf32> to vector<1x128x128xf32>
    tpu.vector_store %arg4[%c0_9, %c0_10, %c0_11], %13 {strides = array<i32>} : memref<1x128x128xf32, #tpu.memory_space<vmem>>, vector<1x128x128xf32>,
    return
  }
  func.func @transform_0(%arg0: i32) -> (i32, i32, i32) {
    %c0_i32 = arith.constant 0 : i32
    %c0_i32_0 = arith.constant 0 : i32
    %c0_i32_1 = arith.constant 0 : i32
    return %arg0, %c0_i32, %c0_i32_0 : i32, i32, i32
  }
  func.func @transform_1(%arg0: i32) -> (i32, i32, i32) {
    %c0_i32 = arith.constant 0 : i32
    %c0_i32_0 = arith.constant 0 : i32
    %c0_i32_1 = arith.constant 0 : i32
    return %arg0, %c0_i32, %c0_i32_0 : i32, i32, i32
  }
  func.func @transform_2(%arg0: i32) -> (i32, i32, i32) {
    %c0_i32 = arith.constant 0 : i32
    %c0_i32_0 = arith.constant 0 : i32
    %c0_i32_1 = arith.constant 0 : i32
    return %arg0, %c0_i32, %c0_i32_0 : i32, i32, i32
  }
  func.func @transform_3(%arg0: i32) -> (i32, i32, i32) {
    %c0_i32 = arith.constant 0 : i32
    %c0_i32_0 = arith.constant 0 : i32
    %c0_i32_1 = arith.constant 0 : i32
    return %arg0, %c0_i32, %c0_i32_0 : i32, i32, i32
  }
}

module attributes {stable_mosaic.version = 11 : i64} {
  func.func @_conv3x3_bn_relu_kernel(%arg0: i32, %arg1: i32, %arg2: i32, %arg3: memref<1x1x320x128xbf16, #tpu.memory_space<vmem>>, %arg4: memref<9x128x128xbf16, #tpu.memory_space<vmem>>, %arg5: memref<1x128xf32, #tpu.memory_space<vmem>>, %arg6: memref<1x1x256x128xf32, #tpu.memory_space<vmem>>, %arg7: memref<3x256x128xf32, #tpu.memory_space<vmem>>) attributes {dimension_semantics = [#tpu.dimension_semantics<parallel>, #tpu.dimension_semantics<parallel>, #tpu.dimension_semantics<arbitrary>], iteration_bounds = array<i64: 2, 2, 1>, scalar_prefetch = 0 : i64, scratch_operands = 1 : i64, tpu.core_type = #tpu.core_type<tc>, window_params = [{transform_indices = @transform_0, window_bounds = array<i64: 1, 1, 320, 128>}, {pipeline_mode = #tpu.pipeline_mode<synchronous>, transform_indices = @transform_1, window_bounds = array<i64: 9, 128, 128>}, {pipeline_mode = #tpu.pipeline_mode<synchronous>, transform_indices = @transform_2, window_bounds = array<i64: 1, 128>}, {transform_indices = @transform_3, window_bounds = array<i64: 1, 1, 256, 128>}]} {
    %c0_i32 = arith.constant 0 : i32
    %0 = arith.cmpi eq, %arg2, %c0_i32 : i32
    %1 = arith.extui %0 : i1 to i32
    %c0_i32_0 = arith.constant 0 : i32
    %2 = arith.cmpi ne, %1, %c0_i32_0 : i32
    scf.if %2 {
      %cst_81 = arith.constant 0.000000e+00 : f32
      %75 = vector.broadcast %cst_81 : f32 to vector<3x256x128xf32>
      %c0_82 = arith.constant 0 : index
      %c0_83 = arith.constant 0 : index
      %c0_84 = arith.constant 0 : index
      %76 = vector.load %arg7[%c0_82, %c0_83, %c0_84] : memref<3x256x128xf32, #tpu.memory_space<vmem>>, vector<3x256x128xf32>
      tpu.vector_store %arg7[%c0_82, %c0_83, %c0_84], %75 {strides = array<i32>} : memref<3x256x128xf32, #tpu.memory_space<vmem>>, vector<3x256x128xf32>,
    } else {
    }
    %c0 = arith.constant 0 : index
    %c0_1 = arith.constant 0 : index
    %c0_2 = arith.constant 0 : index
    %c0_3 = arith.constant 0 : index
    %3 = vector.load %arg3[%c0, %c0_1, %c0_2, %c0_3] : memref<1x1x320x128xbf16, #tpu.memory_space<vmem>>, vector<1x1x256x128xbf16>
    %4 = vector.shape_cast %3 : vector<1x1x256x128xbf16> to vector<256x128xbf16>
    %c0_4 = arith.constant 0 : index
    %c0_5 = arith.constant 0 : index
    %c0_6 = arith.constant 0 : index
    %5 = vector.load %arg4[%c0_4, %c0_5, %c0_6] : memref<9x128x128xbf16, #tpu.memory_space<vmem>>, vector<1x128x128xbf16>
    %6 = vector.shape_cast %5 : vector<1x128x128xbf16> to vector<128x128xbf16>
    %cst = arith.constant dense<0.000000e+00> : vector<256x128xf32>
    %7 = tpu.matmul %4, %6, %cst {dimension_numbers = #tpu.dot_dimension_numbers<[1], [0], [0], [1], [0, 0, 1, 1], [], []>} : vector<256x128xbf16>, vector<128x128xbf16>, vector<256x128xf32> -> vector<256x128xf32>
    %c0_7 = arith.constant 0 : index
    %c0_8 = arith.constant 0 : index
    %c32 = arith.constant 32 : index
    %c0_9 = arith.constant 0 : index
    %8 = vector.load %arg3[%c0_7, %c0_8, %c32, %c0_9] : memref<1x1x320x128xbf16, #tpu.memory_space<vmem>>, vector<1x1x256x128xbf16>
    %9 = vector.shape_cast %8 : vector<1x1x256x128xbf16> to vector<256x128xbf16>
    %c3 = arith.constant 3 : index
    %c0_10 = arith.constant 0 : index
    %c0_11 = arith.constant 0 : index
    %10 = vector.load %arg4[%c3, %c0_10, %c0_11] : memref<9x128x128xbf16, #tpu.memory_space<vmem>>, vector<1x128x128xbf16>
    %11 = vector.shape_cast %10 : vector<1x128x128xbf16> to vector<128x128xbf16>
    %cst_12 = arith.constant dense<0.000000e+00> : vector<256x128xf32>
    %12 = tpu.matmul %9, %11, %cst_12 {dimension_numbers = #tpu.dot_dimension_numbers<[1], [0], [0], [1], [0, 0, 1, 1], [], []>} : vector<256x128xbf16>, vector<128x128xbf16>, vector<256x128xf32> -> vector<256x128xf32>
    %13 = arith.addf %7, %12 : vector<256x128xf32>
    %c0_13 = arith.constant 0 : index
    %c0_14 = arith.constant 0 : index
    %c64 = arith.constant 64 : index
    %c0_15 = arith.constant 0 : index
    %14 = vector.load %arg3[%c0_13, %c0_14, %c64, %c0_15] : memref<1x1x320x128xbf16, #tpu.memory_space<vmem>>, vector<1x1x256x128xbf16>
    %15 = vector.shape_cast %14 : vector<1x1x256x128xbf16> to vector<256x128xbf16>
    %c6 = arith.constant 6 : index
    %c0_16 = arith.constant 0 : index
    %c0_17 = arith.constant 0 : index
    %16 = vector.load %arg4[%c6, %c0_16, %c0_17] : memref<9x128x128xbf16, #tpu.memory_space<vmem>>, vector<1x128x128xbf16>
    %17 = vector.shape_cast %16 : vector<1x128x128xbf16> to vector<128x128xbf16>
    %cst_18 = arith.constant dense<0.000000e+00> : vector<256x128xf32>
    %18 = tpu.matmul %15, %17, %cst_18 {dimension_numbers = #tpu.dot_dimension_numbers<[1], [0], [0], [1], [0, 0, 1, 1], [], []>} : vector<256x128xbf16>, vector<128x128xbf16>, vector<256x128xf32> -> vector<256x128xf32>
    %19 = arith.addf %13, %18 : vector<256x128xf32>
    %c0_19 = arith.constant 0 : index
    %c0_20 = arith.constant 0 : index
    %c0_21 = arith.constant 0 : index
    %20 = vector.load %arg7[%c0_19, %c0_20, %c0_21] : memref<3x256x128xf32, #tpu.memory_space<vmem>>, vector<1x256x128xf32>
    %21 = vector.shape_cast %20 : vector<1x256x128xf32> to vector<256x128xf32>
    %22 = arith.addf %21, %19 : vector<256x128xf32>
    %c0_22 = arith.constant 0 : index
    %c0_23 = arith.constant 0 : index
    %c0_24 = arith.constant 0 : index
    %23 = vector.load %arg7[%c0_22, %c0_23, %c0_24] : memref<3x256x128xf32, #tpu.memory_space<vmem>>, vector<1x256x128xf32>
    %24 = vector.shape_cast %23 : vector<1x256x128xf32> to vector<256x128xf32>
    %25 = vector.shape_cast %22 : vector<256x128xf32> to vector<1x256x128xf32>
    tpu.vector_store %arg7[%c0_22, %c0_23, %c0_24], %25 {strides = array<i32>} : memref<3x256x128xf32, #tpu.memory_space<vmem>>, vector<1x256x128xf32>,
    %c0_25 = arith.constant 0 : index
    %c0_26 = arith.constant 0 : index
    %c0_27 = arith.constant 0 : index
    %c0_28 = arith.constant 0 : index
    %26 = vector.load %arg3[%c0_25, %c0_26, %c0_27, %c0_28] : memref<1x1x320x128xbf16, #tpu.memory_space<vmem>>, vector<1x1x256x128xbf16>
    %27 = vector.shape_cast %26 : vector<1x1x256x128xbf16> to vector<256x128xbf16>
    %c1 = arith.constant 1 : index
    %c0_29 = arith.constant 0 : index
    %c0_30 = arith.constant 0 : index
    %28 = vector.load %arg4[%c1, %c0_29, %c0_30] : memref<9x128x128xbf16, #tpu.memory_space<vmem>>, vector<1x128x128xbf16>
    %29 = vector.shape_cast %28 : vector<1x128x128xbf16> to vector<128x128xbf16>
    %cst_31 = arith.constant dense<0.000000e+00> : vector<256x128xf32>
    %30 = tpu.matmul %27, %29, %cst_31 {dimension_numbers = #tpu.dot_dimension_numbers<[1], [0], [0], [1], [0, 0, 1, 1], [], []>} : vector<256x128xbf16>, vector<128x128xbf16>, vector<256x128xf32> -> vector<256x128xf32>
    %c0_32 = arith.constant 0 : index
    %c0_33 = arith.constant 0 : index
    %c32_34 = arith.constant 32 : index
    %c0_35 = arith.constant 0 : index
    %31 = vector.load %arg3[%c0_32, %c0_33, %c32_34, %c0_35] : memref<1x1x320x128xbf16, #tpu.memory_space<vmem>>, vector<1x1x256x128xbf16>
    %32 = vector.shape_cast %31 : vector<1x1x256x128xbf16> to vector<256x128xbf16>
    %c4 = arith.constant 4 : index
    %c0_36 = arith.constant 0 : index
    %c0_37 = arith.constant 0 : index
    %33 = vector.load %arg4[%c4, %c0_36, %c0_37] : memref<9x128x128xbf16, #tpu.memory_space<vmem>>, vector<1x128x128xbf16>
    %34 = vector.shape_cast %33 : vector<1x128x128xbf16> to vector<128x128xbf16>
    %cst_38 = arith.constant dense<0.000000e+00> : vector<256x128xf32>
    %35 = tpu.matmul %32, %34, %cst_38 {dimension_numbers = #tpu.dot_dimension_numbers<[1], [0], [0], [1], [0, 0, 1, 1], [], []>} : vector<256x128xbf16>, vector<128x128xbf16>, vector<256x128xf32> -> vector<256x128xf32>
    %36 = arith.addf %30, %35 : vector<256x128xf32>
    %c0_39 = arith.constant 0 : index
    %c0_40 = arith.constant 0 : index
    %c64_41 = arith.constant 64 : index
    %c0_42 = arith.constant 0 : index
    %37 = vector.load %arg3[%c0_39, %c0_40, %c64_41, %c0_42] : memref<1x1x320x128xbf16, #tpu.memory_space<vmem>>, vector<1x1x256x128xbf16>
    %38 = vector.shape_cast %37 : vector<1x1x256x128xbf16> to vector<256x128xbf16>
    %c7 = arith.constant 7 : index
    %c0_43 = arith.constant 0 : index
    %c0_44 = arith.constant 0 : index
    %39 = vector.load %arg4[%c7, %c0_43, %c0_44] : memref<9x128x128xbf16, #tpu.memory_space<vmem>>, vector<1x128x128xbf16>
    %40 = vector.shape_cast %39 : vector<1x128x128xbf16> to vector<128x128xbf16>
    %cst_45 = arith.constant dense<0.000000e+00> : vector<256x128xf32>
    %41 = tpu.matmul %38, %40, %cst_45 {dimension_numbers = #tpu.dot_dimension_numbers<[1], [0], [0], [1], [0, 0, 1, 1], [], []>} : vector<256x128xbf16>, vector<128x128xbf16>, vector<256x128xf32> -> vector<256x128xf32>
    %42 = arith.addf %36, %41 : vector<256x128xf32>
    %c1_46 = arith.constant 1 : index
    %c0_47 = arith.constant 0 : index
    %c0_48 = arith.constant 0 : index
    %43 = vector.load %arg7[%c1_46, %c0_47, %c0_48] : memref<3x256x128xf32, #tpu.memory_space<vmem>>, vector<1x256x128xf32>
    %44 = vector.shape_cast %43 : vector<1x256x128xf32> to vector<256x128xf32>
    %45 = arith.addf %44, %42 : vector<256x128xf32>
    %c1_49 = arith.constant 1 : index
    %c0_50 = arith.constant 0 : index
    %c0_51 = arith.constant 0 : index
    %46 = vector.load %arg7[%c1_49, %c0_50, %c0_51] : memref<3x256x128xf32, #tpu.memory_space<vmem>>, vector<1x256x128xf32>
    %47 = vector.shape_cast %46 : vector<1x256x128xf32> to vector<256x128xf32>
    %48 = vector.shape_cast %45 : vector<256x128xf32> to vector<1x256x128xf32>
    tpu.vector_store %arg7[%c1_49, %c0_50, %c0_51], %48 {strides = array<i32>} : memref<3x256x128xf32, #tpu.memory_space<vmem>>, vector<1x256x128xf32>,
    %c0_52 = arith.constant 0 : index
    %c0_53 = arith.constant 0 : index
    %c0_54 = arith.constant 0 : index
    %c0_55 = arith.constant 0 : index
    %49 = vector.load %arg3[%c0_52, %c0_53, %c0_54, %c0_55] : memref<1x1x320x128xbf16, #tpu.memory_space<vmem>>, vector<1x1x256x128xbf16>
    %50 = vector.shape_cast %49 : vector<1x1x256x128xbf16> to vector<256x128xbf16>
    %c2 = arith.constant 2 : index
    %c0_56 = arith.constant 0 : index
    %c0_57 = arith.constant 0 : index
    %51 = vector.load %arg4[%c2, %c0_56, %c0_57] : memref<9x128x128xbf16, #tpu.memory_space<vmem>>, vector<1x128x128xbf16>
    %52 = vector.shape_cast %51 : vector<1x128x128xbf16> to vector<128x128xbf16>
    %cst_58 = arith.constant dense<0.000000e+00> : vector<256x128xf32>
    %53 = tpu.matmul %50, %52, %cst_58 {dimension_numbers = #tpu.dot_dimension_numbers<[1], [0], [0], [1], [0, 0, 1, 1], [], []>} : vector<256x128xbf16>, vector<128x128xbf16>, vector<256x128xf32> -> vector<256x128xf32>
    %c0_59 = arith.constant 0 : index
    %c0_60 = arith.constant 0 : index
    %c32_61 = arith.constant 32 : index
    %c0_62 = arith.constant 0 : index
    %54 = vector.load %arg3[%c0_59, %c0_60, %c32_61, %c0_62] : memref<1x1x320x128xbf16, #tpu.memory_space<vmem>>, vector<1x1x256x128xbf16>
    %55 = vector.shape_cast %54 : vector<1x1x256x128xbf16> to vector<256x128xbf16>
    %c5 = arith.constant 5 : index
    %c0_63 = arith.constant 0 : index
    %c0_64 = arith.constant 0 : index
    %56 = vector.load %arg4[%c5, %c0_63, %c0_64] : memref<9x128x128xbf16, #tpu.memory_space<vmem>>, vector<1x128x128xbf16>
    %57 = vector.shape_cast %56 : vector<1x128x128xbf16> to vector<128x128xbf16>
    %cst_65 = arith.constant dense<0.000000e+00> : vector<256x128xf32>
    %58 = tpu.matmul %55, %57, %cst_65 {dimension_numbers = #tpu.dot_dimension_numbers<[1], [0], [0], [1], [0, 0, 1, 1], [], []>} : vector<256x128xbf16>, vector<128x128xbf16>, vector<256x128xf32> -> vector<256x128xf32>
    %59 = arith.addf %53, %58 : vector<256x128xf32>
    %c0_66 = arith.constant 0 : index
    %c0_67 = arith.constant 0 : index
    %c64_68 = arith.constant 64 : index
    %c0_69 = arith.constant 0 : index
    %60 = vector.load %arg3[%c0_66, %c0_67, %c64_68, %c0_69] : memref<1x1x320x128xbf16, #tpu.memory_space<vmem>>, vector<1x1x256x128xbf16>
    %61 = vector.shape_cast %60 : vector<1x1x256x128xbf16> to vector<256x128xbf16>
    %c8 = arith.constant 8 : index
    %c0_70 = arith.constant 0 : index
    %c0_71 = arith.constant 0 : index
    %62 = vector.load %arg4[%c8, %c0_70, %c0_71] : memref<9x128x128xbf16, #tpu.memory_space<vmem>>, vector<1x128x128xbf16>
    %63 = vector.shape_cast %62 : vector<1x128x128xbf16> to vector<128x128xbf16>
    %cst_72 = arith.constant dense<0.000000e+00> : vector<256x128xf32>
    %64 = tpu.matmul %61, %63, %cst_72 {dimension_numbers = #tpu.dot_dimension_numbers<[1], [0], [0], [1], [0, 0, 1, 1], [], []>} : vector<256x128xbf16>, vector<128x128xbf16>, vector<256x128xf32> -> vector<256x128xf32>
    %65 = arith.addf %59, %64 : vector<256x128xf32>
    %c2_73 = arith.constant 2 : index
    %c0_74 = arith.constant 0 : index
    %c0_75 = arith.constant 0 : index
    %66 = vector.load %arg7[%c2_73, %c0_74, %c0_75] : memref<3x256x128xf32, #tpu.memory_space<vmem>>, vector<1x256x128xf32>
    %67 = vector.shape_cast %66 : vector<1x256x128xf32> to vector<256x128xf32>
    %68 = arith.addf %67, %65 : vector<256x128xf32>
    %c2_76 = arith.constant 2 : index
    %c0_77 = arith.constant 0 : index
    %c0_78 = arith.constant 0 : index
    %69 = vector.load %arg7[%c2_76, %c0_77, %c0_78] : memref<3x256x128xf32, #tpu.memory_space<vmem>>, vector<1x256x128xf32>
    %70 = vector.shape_cast %69 : vector<1x256x128xf32> to vector<256x128xf32>
    %71 = vector.shape_cast %68 : vector<256x128xf32> to vector<1x256x128xf32>
    tpu.vector_store %arg7[%c2_76, %c0_77, %c0_78], %71 {strides = array<i32>} : memref<3x256x128xf32, #tpu.memory_space<vmem>>, vector<1x256x128xf32>,
    %c0_i32_79 = arith.constant 0 : i32
    %72 = arith.cmpi eq, %arg2, %c0_i32_79 : i32
    %73 = arith.extui %72 : i1 to i32
    %c0_i32_80 = arith.constant 0 : i32
    %74 = arith.cmpi ne, %73, %c0_i32_80 : i32
    scf.if %74 {
      %c0_81 = arith.constant 0 : index
      %c0_82 = arith.constant 0 : index
      %c0_83 = arith.constant 0 : index
      %75 = vector.load %arg7[%c0_81, %c0_82, %c0_83] : memref<3x256x128xf32, #tpu.memory_space<vmem>>, vector<1x256x128xf32>
      %76 = vector.shape_cast %75 : vector<1x256x128xf32> to vector<256x128xf32>
      %c1_84 = arith.constant 1 : index
      %c0_85 = arith.constant 0 : index
      %c0_86 = arith.constant 0 : index
      %77 = vector.load %arg7[%c1_84, %c0_85, %c0_86] : memref<3x256x128xf32, #tpu.memory_space<vmem>>, vector<1x256x128xf32>
      %78 = vector.shape_cast %77 : vector<1x256x128xf32> to vector<256x128xf32>
      %c255_i32 = arith.constant 255 : i32
      %79 = tpu.dynamic_rotate %78 by %c255_i32 dim 0 : vector<256x128xf32>, i32 -> vector<256x128xf32>
      %80 = arith.addf %76, %79 : vector<256x128xf32>
      %c2_87 = arith.constant 2 : index
      %c0_88 = arith.constant 0 : index
      %c0_89 = arith.constant 0 : index
      %81 = vector.load %arg7[%c2_87, %c0_88, %c0_89] : memref<3x256x128xf32, #tpu.memory_space<vmem>>, vector<1x256x128xf32>
      %82 = vector.shape_cast %81 : vector<1x256x128xf32> to vector<256x128xf32>
      %c254_i32 = arith.constant 254 : i32
      %83 = tpu.dynamic_rotate %82 by %c254_i32 dim 0 : vector<256x128xf32>, i32 -> vector<256x128xf32>
      %84 = arith.addf %80, %83 : vector<256x128xf32>
      %c0_90 = arith.constant 0 : index
      %c0_91 = arith.constant 0 : index
      %85 = vector.load %arg5[%c0_90, %c0_91] : memref<1x128xf32, #tpu.memory_space<vmem>>, vector<1x128xf32>
      %86 = vector.broadcast %85 : vector<1x128xf32> to vector<256x128xf32>
      %87 = arith.addf %84, %86 : vector<256x128xf32>
      %cst_92 = arith.constant 0.000000e+00 : f32
      %88 = vector.broadcast %cst_92 : f32 to vector<256x128xf32>
      %89 = arith.maximumf %87, %88 : vector<256x128xf32>
      %c0_93 = arith.constant 0 : index
      %c0_94 = arith.constant 0 : index
      %c0_95 = arith.constant 0 : index
      %c0_96 = arith.constant 0 : index
      %90 = vector.load %arg6[%c0_93, %c0_94, %c0_95, %c0_96] : memref<1x1x256x128xf32, #tpu.memory_space<vmem>>, vector<1x1x256x128xf32>
      %91 = vector.shape_cast %90 : vector<1x1x256x128xf32> to vector<256x128xf32>
      %92 = vector.shape_cast %89 : vector<256x128xf32> to vector<1x1x256x128xf32>
      tpu.vector_store %arg6[%c0_93, %c0_94, %c0_95, %c0_96], %92 {strides = array<i32>} : memref<1x1x256x128xf32, #tpu.memory_space<vmem>>, vector<1x1x256x128xf32>,
    } else {
    }
    return
  }
  func.func @transform_0(%arg0: i32, %arg1: i32, %arg2: i32) -> (i32, i32, i32, i32) {
    %c0_i32 = arith.constant 0 : i32
    %c0_i32_0 = arith.constant 0 : i32
    return %arg0, %arg1, %c0_i32, %arg2 : i32, i32, i32, i32
  }
  func.func @transform_1(%arg0: i32, %arg1: i32, %arg2: i32) -> (i32, i32, i32) {
    %c0_i32 = arith.constant 0 : i32
    %c0_i32_0 = arith.constant 0 : i32
    %c0_i32_1 = arith.constant 0 : i32
    %c0_i32_2 = arith.constant 0 : i32
    return %c0_i32, %c0_i32_0, %c0_i32_1 : i32, i32, i32
  }
  func.func @transform_2(%arg0: i32, %arg1: i32, %arg2: i32) -> (i32, i32) {
    %c0_i32 = arith.constant 0 : i32
    %c0_i32_0 = arith.constant 0 : i32
    %c0_i32_1 = arith.constant 0 : i32
    return %c0_i32, %c0_i32_0 : i32, i32
  }
  func.func @transform_3(%arg0: i32, %arg1: i32, %arg2: i32) -> (i32, i32, i32, i32) {
    %c0_i32 = arith.constant 0 : i32
    %c0_i32_0 = arith.constant 0 : i32
    %c0_i32_1 = arith.constant 0 : i32
    return %arg0, %arg1, %c0_i32, %c0_i32_0 : i32, i32, i32, i32
  }
}

</mosaic_0001>

<bundles_post_ra>
// kernel: squeeze.6
= control target key start
LH: loop header
LB: loop body
LE: loop exit
PB: predicated region body
PF: predicated region fallthrough
CT: control target
= control target key end

     0   :  { %vm3_vm0 = vcmask 64512   ;;  %s108_s0 = inlined_call_operand.vmem [shape: f32[1,18,8], index: 0, kind: input, shape index: {}]   ;;  %s109_s1 = inlined_call_operand.vmem [shape: f32[2,3,3,8], index: 1, kind: output, shape index: {}]  }
   0x1   :  { %v2_v0 = vld [vmem:[%s108_s0] sm:$0xff]   ;;  %v64_v1 = vld [vmem:[%s108_s0 + $0x8] sm:$0xff]   ;;  %v65_v2 = vld [vmem:[%s108_s0 + $0x10] sm:$0x3]  }
   0x2   :  { %4 = vst.msk [vmem:[#allocation0] sm:$0x7] %vm3_vm0, %v2_v0   ;;  %6 = vst.msk [vmem:[#allocation0 + $0x5] sm:$0x38] %vm3_vm0, %v2_v0  }
   0x3   :  { %8 = vst.msk [vmem:[#allocation0 + $0xa] sm:$0xc0] %vm3_vm0, %v2_v0   ;;  %13 = vst.msk [vmem:[#allocation0 + $0x12] ss:$6 sm:$0x3] %vm3_vm0, %v64_v1  }
   0x4   :  { %15 = vst.msk [vmem:[#allocation0 + $0x17] sm:$0xc] %vm3_vm0, %v64_v1   ;;  %17 = vst.msk [vmem:[#allocation0 + $0x1c] sm:$0x70] %vm3_vm0, %v64_v1  }
   0x5   :  { %19 = vst.msk [vmem:[#allocation0 + $0x21] sm:$0x80] %vm3_vm0, %v64_v1   ;;  %24 = vst.msk [vmem:[#allocation0 + $0x29] sm:$0x3] %vm3_vm0, %v65_v2  }
   0x9   :  { %v28_v3 = vld [vmem:[#allocation0] sm:$0xf]  ;;  %v32_v4 = vld [vmem:[#allocation0 + $0x8] sm:$0xf] }
   0xa   :  { %v37_v5 = vld [vmem:[#allocation0 + $0x10] sm:$0xf]  ;;  %30 = vst [vmem:[%s109_s1] sm:$0xf] %v28_v3  ;;  %66 = vst [vmem:[%s109_s1 + $0x4] sm:$0xf] %v32_v4 }
   0xb   :  { %67 = vst [vmem:[%s109_s1 + $0x8] sm:$0xf] %v37_v5  ;;  %v43_v6 = vld [vmem:[#allocation0 + $0x18] sm:$0xf]  ;;  %v49_v7 = vld [vmem:[#allocation0 + $0x20] sm:$0xf] }
   0xc   :  { %v55_v8 = vld [vmem:[#allocation0 + $0x28] sm:$0xf]  ;;  %68 = vst [vmem:[%s109_s1 + $0xc] sm:$0xf] %v43_v6  ;;  %69 = vst [vmem:[%s109_s1 + $0x10] sm:$0xf] %v49_v7 }
   0xd   :  { %70 = vst [vmem:[%s109_s1 + $0x14] sm:$0xf] %v55_v8 }

// kernel: psp_module_forward.2
= control target key start
LH: loop header
LB: loop body
LE: loop exit
PB: predicated region body
PF: predicated region fallthrough
CT: control target
= control target key end

     0   :  { %s695_s12 = smov 0   ;;  %s761_s0 = inlined_call_operand.vmem [shape: bf16[4,128,128], index: 0, kind: input, shape index: {}]   ;;  %s762_s1 = inlined_call_operand.vmem [shape: bf16[4,128,128], index: 1, kind: input, shape index: {}]   ;;  %s763_s2 = inlined_call_operand.vmem [shape: f32[4,1,128], index: 2, kind: input, shape index: {}]   ;;  %s764_s3 = inlined_call_operand.vmem [shape: f32[4,128,128], index: 3, kind: output, shape index: {}]  }
   0x1 LB: > { %s546_s13 = sadd.s32 4294967295, %s673_s12   ;;  %p550_p0 = scmp.ge.s32.totalorder %s673_s12, 1  ;;  %s673_s12 = sphi %s695_s12, %s13_s12  }
   0x2   : > { %p155_p1 = scmp.lt.s32.totalorder %s673_s12, 5 }
   0x4   : > { %p156_p2 = pnand %p550_p0, %p155_p1 }
   0x5   : > { %p187_p3 = scmp.lt.s32.totalorder (!%p156_p2), %s546_s13, 3 }
   0x6   : > { %159 = sbr.rel (%p156_p2) target bundleno = 277 (0x115), region = 32 }
   0xd   : > { %s766_s13 = smov (!%p187_p3, %s546_s13), 3 }
   0xe   : > { %s576_s14 = sshll.u32 %s766_s13, 6  ;;  %s199_s23 = scalar_lea.vmem %s763_s2, %s766_s13 }
   0xf   : > { %s709_s17 = scalar_lea.vmem %s762_s1, %s576_s14  ;;  %s717_s20 = scalar_lea.vmem %s761_s0, %s576_s14  ;;  %v557_v16 = vld [vmem:[%s199_s23] ss:$0 sm:$0xff] }
  0x10   : > { %v651_v0 = vld [vmem:[%s709_s17] sm:$0xff]   ;;  %v652_v1 = vld [vmem:[%s709_s17 + $0x8] sm:$0xff]   ;;  %v653_v2 = vld [vmem:[%s709_s17 + $0x10] sm:$0xff]   ;;  %s578_s24 = sshll.u32 %s766_s13, 7 }
  0x11   : > { %595 = vmatprep.subr.bf16.mxu0 %v651_v0  ;;  %627 = vmatprep.subr.bf16.mxu1 %v651_v0  ;;  %v654_v3 = vld [vmem:[%s709_s17 + $0x18] sm:$0xff]   ;;  %v659_v4 = vld [vmem:[%s717_s20] sm:$0xff]   ;;  %v656_v7 = vld [vmem:[%s709_s17 + $0x28] sm:$0xff]   ;;  %s740_s27 = scalar_lea.vmem %s764_s3, %s578_s24 }
  0x12   : > { %596 = vmatpush3.bf16.msra.mxu0 %v651_v0  ;;  %635 = vmatpush3.bf16.msra.mxu1 %v651_v0  ;;  %v660_v5 = vld [vmem:[%s717_s20 + $0x20] sm:$0xff]   ;;  %v657_v8 = vld [vmem:[%s709_s17 + $0x30] sm:$0xff]   ;;  %v658_v9 = vld [vmem:[%s709_s17 + $0x38] sm:$0xff]  }
  0x13   : > { %597 = vmatprep.subr.bf16.mxu0 %v652_v1  ;;  %628 = vmatprep.subr.bf16.mxu1 %v652_v1  ;;  %v655_v6 = vld [vmem:[%s709_s17 + $0x20] sm:$0xff]   ;;  %v661_v10 = vld [vmem:[%s717_s20 + $0x8] sm:$0xff]   ;;  %v663_v12 = vld [vmem:[%s717_s20 + $0x10] sm:$0xff]  }
  0x14   : > { %611 = vmatprep.mubr.bf16.mxu0 %v659_v4  ;;  %619 = vmatprep.mubr.bf16.mxu1 %v660_v5  ;;  %v662_v11 = vld [vmem:[%s717_s20 + $0x28] sm:$0xff]   ;;  %v664_v13 = vld [vmem:[%s717_s20 + $0x30] sm:$0xff]   ;;  %v665_v14 = vld [vmem:[%s717_s20 + $0x18] sm:$0xff]  }
  0x15   : > { %v666_v15 = vld [vmem:[%s717_s20 + $0x38] sm:$0xff]  }
  0x16   : > { %598 = vmatpush3.bf16.msra.mxu0 %v652_v1  ;;  %636 = vmatpush3.bf16.msra.mxu1 %v652_v1 }
  0x17   : > { %599 = vmatprep.subr.bf16.mxu0 %v653_v2  ;;  %629 = vmatprep.subr.bf16.mxu1 %v653_v2 }
  0x1a   : > { %600 = vmatpush3.bf16.msra.mxu0 %v653_v2  ;;  %637 = vmatpush3.bf16.msra.mxu1 %v653_v2 }
  0x1b   : > { %601 = vmatprep.subr.bf16.mxu0 %v654_v3  ;;  %630 = vmatprep.subr.bf16.mxu1 %v654_v3 }
  0x1e   : > { %602 = vmatpush3.bf16.msra.mxu0 %v654_v3  ;;  %638 = vmatpush3.bf16.msra.mxu1 %v654_v3 }
  0x1f   : > { %603 = vmatprep.subr.bf16.mxu0 %v655_v6  ;;  %631 = vmatprep.subr.bf16.mxu1 %v655_v6 }
  0x22   : > { %604 = vmatpush3.bf16.msra.mxu0 %v655_v6  ;;  %639 = vmatpush3.bf16.msra.mxu1 %v655_v6 }
  0x23   : > { %605 = vmatprep.subr.bf16.mxu0 %v656_v7  ;;  %632 = vmatprep.subr.bf16.mxu1 %v656_v7 }
  0x26   : > { %606 = vmatpush3.bf16.msra.mxu0 %v656_v7  ;;  %640 = vmatpush3.bf16.msra.mxu1 %v656_v7 }
  0x27   : > { %607 = vmatprep.subr.bf16.mxu0 %v657_v8  ;;  %633 = vmatprep.subr.bf16.mxu1 %v657_v8 }
  0x2a   : > { %608 = vmatpush3.bf16.msra.mxu0 %v657_v8  ;;  %641 = vmatpush3.bf16.msra.mxu1 %v657_v8 }
  0x2b   : > { %609 = vmatprep.subr.bf16.mxu0 %v658_v9  ;;  %634 = vmatprep.subr.bf16.mxu1 %v658_v9 }
  0x2e   : > { %610 = vmatpush3.bf16.msra.mxu0 %v658_v9  ;;  %642 = vmatpush3.bf16.msra.mxu1 %v658_v9 }
  0x31   : > { %612 = vmatmul.mubr.bf16.vlgmr.msra.gmra.mrb[0].mxu0 %v661_v10  ;;  %620 = vmatmul.mubr.bf16.vlgmr.msra.gmra.mrb[0].mxu1 %v662_v11 }
  0x32   : > { %615 = vmatprep.mubr.bf16.mxu0 %v663_v12  ;;  %623 = vmatprep.mubr.bf16.mxu1 %v664_v13 }
  0x39   : > { %616 = vmatmul.mubr.bf16.gmra.mrb[4].mxu0 %v665_v14  ;;  %624 = vmatmul.mubr.bf16.gmra.mrb[4].mxu1 %v666_v15 }
 0x104   : > { %v613_v17 = vpop.f32.mrb[0].mxu0  ;;  %v621_v18 = vpop.f32.mrb[0].mxu1 }
 0x105   : > { %v384_v19 = vadd.f32 %v613_v17, %v557_v16  ;;  %v416_v20 = vadd.f32 %v621_v18, %v557_v16  ;;  %v375_v21 = vpop.f32.mrb[1].mxu0  ;;  %v407_v22 = vpop.f32.mrb[1].mxu1 }
 0x106   : > { %v376_v23 = vadd.f32 %v557_v16, %v375_v21  ;;  %v408_v24 = vadd.f32 %v557_v16, %v407_v22  ;;  %v614_v25 = vpop.f32.mrb[2].mxu0  ;;  %v622_v26 = vpop.f32.mrb[2].mxu1 }
 0x107   : > { %v440_v27 = vmax.f32 %v384_v19, 0.0  ;;  %v448_v28 = vmax.f32 %v416_v20, 0.0  ;;  %v387_v29 = vadd.f32 %v614_v25, %v557_v16  ;;  %v419_v30 = vadd.f32 %v622_v26, %v557_v16  ;;  %v378_v31 = vpop.f32.mrb[3].mxu0  ;;  %v410_v32 = vpop.f32.mrb[3].mxu1 }
 0x108   : > { %v438_v33 = vmax.f32 %v376_v23, 0.0  ;;  %v446_v34 = vmax.f32 %v408_v24, 0.0  ;;  %v379_v35 = vadd.f32 %v557_v16, %v378_v31  ;;  %v411_v36 = vadd.f32 %v557_v16, %v410_v32 }
 0x109   : > { %456 = vst [vmem:[%s740_s27 + $0x10] sm:$0xff] %v440_v27  ;;  %464 = vst [vmem:[%s740_s27 + $0x50] sm:$0xff] %v448_v28  ;;  %v441_v37 = vmax.f32 %v387_v29, 0.0  ;;  %v449_v38 = vmax.f32 %v419_v30, 0.0 }
 0x10a   : > { %454 = vst [vmem:[%s740_s27] sm:$0xff] %v438_v33  ;;  %462 = vst [vmem:[%s740_s27 + $0x40] sm:$0xff] %v446_v34  ;;  %v439_v39 = vmax.f32 %v379_v35, 0.0  ;;  %v447_v40 = vmax.f32 %v411_v36, 0.0 }
 0x10b   : > { %457 = vst [vmem:[%s740_s27 + $0x18] sm:$0xff] %v441_v37  ;;  %465 = vst [vmem:[%s740_s27 + $0x58] sm:$0xff] %v449_v38 }
 0x10c   : > { %455 = vst [vmem:[%s740_s27 + $0x8] sm:$0xff] %v439_v39  ;;  %463 = vst [vmem:[%s740_s27 + $0x48] sm:$0xff] %v447_v40  ;;  %v617_v41 = vpop.f32.mrb[4].mxu0  ;;  %v625_v42 = vpop.f32.mrb[4].mxu1 }
 0x10d   : > { %v400_v43 = vadd.f32 %v617_v41, %v557_v16  ;;  %v432_v44 = vadd.f32 %v625_v42, %v557_v16  ;;  %v391_v45 = vpop.f32.mrb[5].mxu0  ;;  %v423_v46 = vpop.f32.mrb[5].mxu1 }
 0x10e   : > { %v392_v47 = vadd.f32 %v557_v16, %v391_v45  ;;  %v424_v48 = vadd.f32 %v557_v16, %v423_v46  ;;  %v618_v49 = vpop.f32.mrb[6].mxu0  ;;  %v626_v50 = vpop.f32.mrb[6].mxu1 }
 0x10f   : > { %v444_v51 = vmax.f32 %v400_v43, 0.0  ;;  %v452_v52 = vmax.f32 %v432_v44, 0.0  ;;  %v403_v53 = vadd.f32 %v618_v49, %v557_v16  ;;  %v435_v54 = vadd.f32 %v626_v50, %v557_v16  ;;  %v394_v55 = vpop.f32.mrb[7].mxu0  ;;  %v426_v56 = vpop.f32.mrb[7].mxu1 }
 0x110   : > { %v442_v57 = vmax.f32 %v392_v47, 0.0  ;;  %v450_v58 = vmax.f32 %v424_v48, 0.0  ;;  %v395_v59 = vadd.f32 %v557_v16, %v394_v55  ;;  %v427_v60 = vadd.f32 %v557_v16, %v426_v56 }
 0x111   : > { %460 = vst [vmem:[%s740_s27 + $0x30] sm:$0xff] %v444_v51  ;;  %468 = vst [vmem:[%s740_s27 + $0x70] sm:$0xff] %v452_v52  ;;  %v445_v61 = vmax.f32 %v403_v53, 0.0  ;;  %v453_v62 = vmax.f32 %v435_v54, 0.0 }
 0x112   : > { %458 = vst [vmem:[%s740_s27 + $0x20] sm:$0xff] %v442_v57  ;;  %466 = vst [vmem:[%s740_s27 + $0x60] sm:$0xff] %v450_v58  ;;  %v443_v63 = vmax.f32 %v395_v59, 0.0  ;;  %v451_v0 = vmax.f32 %v427_v60, 0.0 }
 0x113   : > { %461 = vst [vmem:[%s740_s27 + $0x38] sm:$0xff] %v445_v61  ;;  %469 = vst [vmem:[%s740_s27 + $0x78] sm:$0xff] %v453_v62 }
 0x114   : > { %459 = vst [vmem:[%s740_s27 + $0x28] sm:$0xff] %v443_v63  ;;  %467 = vst [vmem:[%s740_s27 + $0x68] sm:$0xff] %v451_v0 }
 0x115 PF: > { %s13_s12 = sadd.s32 1, %s673_s12  }
 0x116   : > { %p10_p4 = scmp.ge.s32.totalorder %s13_s12, 6  }
 0x118   :  { %12 = sbr.rel (!%p10_p4) target bundleno = 1 (0x1), region = 68 }

// kernel: psp_module_forward.3
= control target key start
LH: loop header
LB: loop body
LE: loop exit
PB: predicated region body
PF: predicated region fallthrough
CT: control target
= control target key end

     0   :  { %s5506_s12 = smov 0   ;;  %s5508_s13 = smov 0   ;;  %s6402_s0 = inlined_call_operand.vmem [shape: bf16[2,2,320,128], index: 0, kind: input, shape index: {}]   ;;  %s6403_s1 = inlined_call_operand.vmem [shape: bf16[9,128,128], index: 1, kind: input, shape index: {}]   ;;  %s6404_s2 = inlined_call_operand.vmem [shape: f32[1,128], index: 2, kind: input, shape index: {}]   ;;  %s6405_s3 = inlined_call_operand.vmem [shape: f32[2,2,256,128], index: 3, kind: output, shape index: {}]  }
   0x1   :  { %s5510_s14 = smov 0   ;;  %s5512_s15 = smov 0  }
   0x2   :  { %s5514_s16 = smov 0  }
   0x3 LB: > { %s28_s17 = sadd.s32 1, %s5476_s14  ;;  %s32_s18 = sadd.s32 1, %s5480_s15  ;;  %s5484_s16 = sphi %s5514_s16, %s13_s16   ;;  %s5480_s15 = sphi %s5512_s15, %s6409_s15   ;;  %s5476_s14 = sphi %s5510_s14, %s6408_s14   ;;  %s5472_s13 = sphi %s5508_s13, %s6407_s13   ;;  %s5468_s12 = sphi %s5506_s12, %s6406_s12  }
   0x4   : > { %p30_p0 = scmp.ge.s32.totalorder %s28_s17, 2  ;;  %p4064_p1 = scmp.ge.s32.totalorder %s5484_s16, 1 }
   0x5   : > { %p169_p2 = scmp.lt.s32.totalorder %s5484_s16, 5 }
   0x6   : > { %s6411_s17 = smov (%p30_p0, %s28_s17), 0  ;;  %s6413_s18 = smov (!%p30_p0, %s32_s18), %s5480_s15 }
   0x7   : > { %p170_p3 = pnand %p4064_p1, %p169_p2  ;;  %p34_p4 = scmp.ge.s32.totalorder %s6413_s18, 2 }
   0x8   : > { %v5272_v0 = vld [vmem:[%s6403_s1 + $0xc0] sm:$0xff] (!%p170_p3)   ;;  %p204_p5 = scmp.lt.s32.totalorder (!%p170_p3), %s5472_s13, 1  ;;  %p206_p6 = scmp.lt.s32.totalorder (!%p170_p3), %s5468_s12, 1  ;;  %v5274_v2 = vld [vmem:[%s6403_s1 + $0xc8] sm:$0xff] (!%p170_p3)   ;;  %v5276_v4 = vld [vmem:[%s6403_s1 + $0xd0] sm:$0xff] (!%p170_p3)  }
   0x9   : > { %s6415_s18 = smov (%p34_p4, %s6413_s18), 0  ;;  %173 = sbr.rel (%p170_p3) target bundleno = 554 (0x22a), region = 32 }
   0xa   : > { %v5542_v1 = vld [vmem:[%s6403_s1] sm:$0xff] (!%p170_p3)   ;;  %4590 = vmatprep.subr.bf16.mxu1 (!%p170_p3), %v5272_v0  ;;  %v5553_v3 = vld [vmem:[%s6403_s1 + $0x8] sm:$0xff] (!%p170_p3)   ;;  %v5566_v5 = vld [vmem:[%s6403_s1 + $0x10] sm:$0xff] (!%p170_p3)  }
   0xb   : > { %4638 = vmatprep.subr.bf16.mxu0 (!%p170_p3), %v5542_v1  ;;  %4591 = vmatpush3.bf16.msra.mxu1 (!%p170_p3), %v5272_v0  ;;  %v5278_v6 = vld [vmem:[%s6403_s1 + $0xd8] sm:$0xff] (!%p170_p3)   ;;  %v5280_v8 = vld [vmem:[%s6403_s1 + $0xe0] sm:$0xff] (!%p170_p3)   ;;  %v5282_v10 = vld [vmem:[%s6403_s1 + $0xe8] sm:$0xff] (!%p170_p3)  }
   0xc   : > { %4639 = vmatpush3.bf16.msra.mxu0 (!%p170_p3), %v5542_v1  ;;  %4592 = vmatprep.subr.bf16.mxu1 (!%p170_p3), %v5274_v2  ;;  %v5577_v7 = vld [vmem:[%s6403_s1 + $0x18] sm:$0xff] (!%p170_p3)   ;;  %v5587_v9 = vld [vmem:[%s6403_s1 + $0x20] sm:$0xff] (!%p170_p3)   ;;  %v5600_v11 = vld [vmem:[%s6403_s1 + $0x28] sm:$0xff] (!%p170_p3)  }
   0xd   : > { %4640 = vmatprep.subr.bf16.mxu0 (!%p170_p3), %v5553_v3  ;;  %v5284_v14 = vld [vmem:[%s6403_s1 + $0xf0] sm:$0xff] (!%p170_p3)   ;;  %v5286_v16 = vld [vmem:[%s6403_s1 + $0xf8] sm:$0xff] (!%p170_p3)   ;;  %v5292_v18 = vld [vmem:[%s6403_s1 + $0x180] sm:$0xff] (!%p170_p3)  }
   0xe   : > { %v5614_v15 = vld [vmem:[%s6403_s1 + $0x30] sm:$0xff] (!%p170_p3)   ;;  %v5624_v17 = vld [vmem:[%s6403_s1 + $0x38] sm:$0xff] (!%p170_p3)   ;;  %v5293_v22 = vld [vmem:[%s6403_s1 + $0x188] sm:$0xff] (!%p170_p3)  }
   0xf   : > { %4593 = vmatpush3.bf16.msra.mxu1 (!%p170_p3), %v5274_v2  ;;  %v5296_v23 = vld [vmem:[%s6403_s1 + $0x190] sm:$0xff] (!%p170_p3)   ;;  %v5297_v26 = vld [vmem:[%s6403_s1 + $0x198] sm:$0xff] (!%p170_p3)   ;;  %v5300_v27 = vld [vmem:[%s6403_s1 + $0x1a0] sm:$0xff] (!%p170_p3)  }
  0x10   : > { %s6417_s13 = smov (!%p204_p5, %s5472_s13), 1  ;;  %s6419_s12 = smov (!%p206_p6, %s5468_s12), 1  ;;  %4641 = vmatpush3.bf16.msra.mxu0 %v5553_v3  ;;  %4594 = vmatprep.subr.bf16.mxu1 %v5276_v4  ;;  %v5301_v30 = vld [vmem:[%s6403_s1 + $0x1a8] sm:$0xff]   ;;  %v5304_v31 = vld [vmem:[%s6403_s1 + $0x1b0] sm:$0xff]   ;;  %v5305_v35 = vld [vmem:[%s6403_s1 + $0x1b8] sm:$0xff]  }
  0x11   : > { %s5231_s29 = smul.u32 80, %s6417_s13  ;;  %4642 = vmatprep.subr.bf16.mxu0 %v5566_v5  ;;  %v5310_v38 = vld [vmem:[%s6403_s1 + $0x140] sm:$0xff]   ;;  %v5315_v42 = vld [vmem:[%s6403_s1 + $0x148] sm:$0xff]   ;;  %v5320_v44 = vld [vmem:[%s6403_s1 + $0x150] sm:$0xff]   ;;  %s4067_s9 = sshll.u32 %s6417_s13, 6 }
  0x12   : > { %s5230_s5 = smul.u32 40, %s6419_s12  ;;  %v5328_v39 = vld [vmem:[%s6403_s1 + $0x100] sm:$0xff]   ;;  %v5325_v48 = vld [vmem:[%s6403_s1 + $0x158] sm:$0xff]   ;;  %v5334_v54 = vld [vmem:[%s6403_s1 + $0x168] sm:$0xff]  }
  0x13   : > { %4595 = vmatpush3.bf16.msra.mxu1 %v5276_v4  ;;  %v5329_v50 = vld [vmem:[%s6403_s1 + $0x160] sm:$0xff]   ;;  %v5339_v55 = vld [vmem:[%s6403_s1 + $0x170] sm:$0xff]   ;;  %v5344_v59 = vld [vmem:[%s6403_s1 + $0x178] sm:$0xff]  }
  0x14   : > { %s213_s6 = sadd.s32 %s5231_s29, %s5230_s5  ;;  %4643 = vmatpush3.bf16.msra.mxu0 %v5566_v5  ;;  %4596 = vmatprep.subr.bf16.mxu1 %v5278_v6  ;;  %v5351_v60 = vld [vmem:[%s6403_s1 + $0x80] sm:$0xff]   ;;  %v5330_v62 = vld [vmem:[%s6403_s1 + $0x108] sm:$0xff]   ;;  %v5333_v0 = vld [vmem:[%s6403_s1 + $0x110] sm:$0xff]  }
  0x15   : > { %s4065_s11 = sshll.u32 %s213_s6, 2  ;;  %4644 = vmatprep.subr.bf16.mxu0 %v5577_v7  ;;  %v5335_v2 = vld [vmem:[%s6403_s1 + $0x118] sm:$0xff]   ;;  %v5338_v4 = vld [vmem:[%s6403_s1 + $0x120] sm:$0xff]  }
  0x16   : > { %s5592_s25 = scalar_lea.vmem %s6402_s0, %s4065_s11 }
  0x17   : > { %4597 = vmatpush3.bf16.msra.mxu1 %v5278_v6  ;;  %v5288_v12 = vld [vmem:[%s5592_s25 + $0x10] sm:$0xff]   ;;  %v5289_v13 = vld [vmem:[%s5592_s25] sm:$0xff]   ;;  %v5290_v19 = vld [vmem:[%s5592_s25 + $0x18] sm:$0xff]  }
  0x18   : > { %4645 = vmatpush3.bf16.msra.mxu0 %v5577_v7  ;;  %4598 = vmatprep.subr.bf16.mxu1 %v5280_v8  ;;  %v5291_v20 = vld [vmem:[%s5592_s25 + $0x8] sm:$0xff]   ;;  %v5294_v21 = vld [vmem:[%s5592_s25 + $0x20] sm:$0xff]   ;;  %v5298_v25 = vld [vmem:[%s5592_s25 + $0x30] sm:$0xff]  }
  0x19   : > { %4646 = vmatprep.subr.bf16.mxu0 %v5587_v9  ;;  %4606 = vmatprep.mubr.bf16.mxu1 %v5288_v12  ;;  %v5295_v24 = vld [vmem:[%s5592_s25 + $0x28] sm:$0xff]   ;;  %v5299_v28 = vld [vmem:[%s5592_s25 + $0x38] sm:$0xff]   ;;  %v5658_v29 = vld [vmem:[%s5592_s25 + $0x40] sm:$0xff]  }
  0x1a   : > { %4654 = vmatprep.mubr.bf16.mxu0 %v5289_v13  ;;  %v5671_v32 = vld [vmem:[%s5592_s25 + $0x48] sm:$0xff]   ;;  %v5675_v33 = vld [vmem:[%s5592_s25 + $0x50] sm:$0xff]   ;;  %v5307_v34 = vld [vmem:[%s5592_s25 + $0x20] sm:$0xff]  }
  0x1b   : > { %4599 = vmatpush3.bf16.msra.mxu1 %v5280_v8  ;;  %v5686_v36 = vld [vmem:[%s5592_s25 + $0x58] sm:$0xff]   ;;  %v5309_v37 = vld [vmem:[%s5592_s25 + $0x28] sm:$0xff]   ;;  %v5698_v40 = vld [vmem:[%s5592_s25 + $0x60] sm:$0xff]  }
  0x1c   : > { %4647 = vmatpush3.bf16.msra.mxu0 %v5587_v9  ;;  %4600 = vmatprep.subr.bf16.mxu1 %v5282_v10  ;;  %v5312_v41 = vld [vmem:[%s5592_s25 + $0x30] sm:$0xff]   ;;  %v5708_v43 = vld [vmem:[%s5592_s25 + $0x68] sm:$0xff]   ;;  %v5314_v45 = vld [vmem:[%s5592_s25 + $0x38] sm:$0xff]  }
  0x1d   : > { %4648 = vmatprep.subr.bf16.mxu0 %v5600_v11  ;;  %v5715_v46 = vld [vmem:[%s5592_s25 + $0x70] sm:$0xff]   ;;  %v5317_v47 = vld [vmem:[%s5592_s25 + $0x40] sm:$0xff]   ;;  %v5724_v49 = vld [vmem:[%s5592_s25 + $0x78] sm:$0xff]  }
  0x1e   : > { %v5319_v51 = vld [vmem:[%s5592_s25 + $0x48] sm:$0xff]   ;;  %v5321_v52 = vld [vmem:[%s5592_s25 + $0x80] sm:$0xff]   ;;  %v5322_v53 = vld [vmem:[%s5592_s25 + $0x50] sm:$0xff]  }
  0x1f   : > { %4601 = vmatpush3.bf16.msra.mxu1 %v5282_v10  ;;  %v5323_v56 = vld [vmem:[%s5592_s25 + $0x88] sm:$0xff]   ;;  %v5324_v57 = vld [vmem:[%s5592_s25 + $0x58] sm:$0xff]   ;;  %v5326_v58 = vld [vmem:[%s5592_s25 + $0x60] sm:$0xff]  }
  0x20   : > { %4649 = vmatpush3.bf16.msra.mxu0 %v5600_v11  ;;  %4602 = vmatprep.subr.bf16.mxu1 %v5284_v14  ;;  %v5327_v61 = vld [vmem:[%s5592_s25 + $0x68] sm:$0xff]   ;;  %v5331_v63 = vld [vmem:[%s5592_s25 + $0x70] sm:$0xff]   ;;  %v5345_v10 = vld [vmem:[%s6403_s1 + $0x138] sm:$0xff]  }
  0x21   : > { %4650 = vmatprep.subr.bf16.mxu0 %v5614_v15  ;;  %v5340_v6 = vld [vmem:[%s6403_s1 + $0x128] sm:$0xff]   ;;  %v5343_v8 = vld [vmem:[%s6403_s1 + $0x130] sm:$0xff]   ;;  %v5349_v13 = vld [vmem:[%s6403_s1 + $0x40] sm:$0xff]  }
  0x23   : > { %4603 = vmatpush3.bf16.msra.mxu1 %v5284_v14  ;;  %v5796_v14 = vld [vmem:[%s5592_s25 + $0x18] sm:$0xff]  }
  0x24   : > { %4651 = vmatpush3.bf16.msra.mxu0 %v5614_v15  ;;  %4604 = vmatprep.subr.bf16.mxu1 %v5286_v16 }
  0x25   : > { %4652 = vmatprep.subr.bf16.mxu0 %v5624_v17 }
  0x27   : > { %4605 = vmatpush3.bf16.msra.mxu1 %v5286_v16  ;;  %v5802_v16 = vld [vmem:[%s5592_s25 + $0x20] sm:$0xff]  }
  0x28   : > { %4653 = vmatpush3.bf16.msra.mxu0 %v5624_v17  ;;  %5022 = vmatprep.subr.bf16.mxu1 %v5542_v1 }
  0x29   : > { %4686 = vmatprep.subr.bf16.mxu0 %v5292_v18 }
  0x2a   : > { %4607 = vmatmul.mubr.bf16.vlgmr.msra.gmra.mrb[0].mxu1 %v5290_v19 }
  0x2b   : > { %4655 = vmatmul.mubr.bf16.vlgmr.msra.gmra.mrb[0].mxu0 %v5291_v20  ;;  %5030 = vmatpush3.bf16.msra.mxu1 %v5542_v1  ;;  %v5332_v1 = vld [vmem:[%s5592_s25 + $0x78] sm:$0xff]   ;;  %v5817_v20 = vld [vmem:[%s5592_s25 + $0x28] sm:$0xff]  }
  0x2c   : > { %4687 = vmatpush3.bf16.msra.mxu0 %v5292_v18  ;;  %4610 = vmatprep.mubr.bf16.mxu1 %v5294_v21  ;;  %v5355_v18 = vld [vmem:[%s6403_s1 + $0x48] sm:$0xff]  }
  0x2d   : > { %4688 = vmatprep.subr.bf16.mxu0 %v5293_v22  ;;  %4658 = vmatprep.mubr.bf16.mxu0 %v5288_v12  ;;  %v5787_v12 = vld [vmem:[%s5592_s25 + $0x10] sm:$0xff]  }
  0x2e   : > { %5023 = vmatprep.subr.bf16.mxu1 %v5553_v3 }
  0x2f   : > { %5031 = vmatpush3.bf16.msra.mxu1 %v5553_v3  ;;  %v5336_v3 = vld [vmem:[%s5592_s25 + $0x80] sm:$0xff]  }
  0x30   : > { %4689 = vmatpush3.bf16.msra.mxu0 %v5293_v22  ;;  %5024 = vmatprep.subr.bf16.mxu1 %v5566_v5  ;;  %v5363_v22 = vld [vmem:[%s6403_s1 + $0x90] sm:$0xff]  }
  0x31   : > { %4690 = vmatprep.subr.bf16.mxu0 %v5296_v23 }
  0x32   : > { %4611 = vmatmul.mubr.bf16.gmra.mrb[4].mxu1 %v5295_v24 }
  0x33   : > { %4659 = vmatmul.mubr.bf16.gmra.mrb[4].mxu0 %v5290_v19  ;;  %4614 = vmatprep.mubr.bf16.mxu1 %v5298_v25  ;;  %v5357_v19 = vld [vmem:[%s6403_s1 + $0x88] sm:$0xff]  }
  0x34   : > { %4691 = vmatpush3.bf16.msra.mxu0 %v5296_v23  ;;  %4662 = vmatprep.mubr.bf16.mxu0 %v5294_v21  ;;  %v5361_v21 = vld [vmem:[%s6403_s1 + $0x50] sm:$0xff]   ;;  %v5827_v23 = vld [vmem:[%s5592_s25 + $0x28] sm:$0xff]  }
  0x35   : > { %4692 = vmatprep.subr.bf16.mxu0 %v5297_v26  ;;  %5032 = vmatpush3.bf16.msra.mxu1 %v5566_v5  ;;  %v5337_v5 = vld [vmem:[%s5592_s25 + $0x88] sm:$0xff]  }
  0x36   : > { %5025 = vmatprep.subr.bf16.mxu1 %v5577_v7 }
  0x38   : > { %4693 = vmatpush3.bf16.msra.mxu0 %v5297_v26  ;;  %v5367_v26 = vld [vmem:[%s6403_s1 + $0x58] sm:$0xff]  }
  0x39   : > { %4694 = vmatprep.subr.bf16.mxu0 %v5300_v27  ;;  %5033 = vmatpush3.bf16.msra.mxu1 %v5577_v7  ;;  %v5341_v7 = vld [vmem:[%s5592_s25 + $0x90] sm:$0xff]  }
  0x3a   : > { %4615 = vmatmul.mubr.bf16.gmra.mrb[8].mxu1 %v5299_v28  ;;  %5026 = vmatprep.subr.bf16.mxu1 %v5587_v9 }
  0x3b   : > { %4663 = vmatmul.mubr.bf16.gmra.mrb[8].mxu0 %v5295_v24  ;;  %4618 = vmatprep.mubr.bf16.mxu1 %v5658_v29  ;;  %v5830_v24 = vld [vmem:[%s5592_s25 + $0x30] sm:$0xff]  }
  0x3c   : > { %4695 = vmatpush3.bf16.msra.mxu0 %v5300_v27  ;;  %4666 = vmatprep.mubr.bf16.mxu0 %v5298_v25  ;;  %v5833_v25 = vld [vmem:[%s5592_s25 + $0x30] sm:$0xff]   ;;  %v5369_v27 = vld [vmem:[%s6403_s1 + $0x98] sm:$0xff]  }
  0x3d   : > { %4696 = vmatprep.subr.bf16.mxu0 %v5301_v30  ;;  %5034 = vmatpush3.bf16.msra.mxu1 %v5587_v9  ;;  %v5342_v9 = vld [vmem:[%s5592_s25 + $0x98] sm:$0xff]  }
  0x3e   : > { %5027 = vmatprep.subr.bf16.mxu1 %v5600_v11 }
  0x40   : > { %4697 = vmatpush3.bf16.msra.mxu0 %v5301_v30  ;;  %v5373_v30 = vld [vmem:[%s6403_s1 + $0x60] sm:$0xff]  }
  0x41   : > { %4698 = vmatprep.subr.bf16.mxu0 %v5304_v31  ;;  %5035 = vmatpush3.bf16.msra.mxu1 %v5600_v11  ;;  %v5784_v11 = vld [vmem:[%s5592_s25 + $0x10] sm:$0xff]  }
  0x42   : > { %4619 = vmatmul.mubr.bf16.gmra.mrb[12].mxu1 %v5671_v32  ;;  %5028 = vmatprep.subr.bf16.mxu1 %v5614_v15 }
  0x43   : > { %4667 = vmatmul.mubr.bf16.gmra.mrb[12].mxu0 %v5299_v28  ;;  %4622 = vmatprep.mubr.bf16.mxu1 %v5675_v33  ;;  %v5846_v28 = vld [vmem:[%s5592_s25 + $0x38] sm:$0xff]  }
  0x44   : > { %4699 = vmatpush3.bf16.msra.mxu0 %v5304_v31  ;;  %4702 = vmatprep.mubr.bf16.mxu0 %v5307_v34  ;;  %v5375_v31 = vld [vmem:[%s6403_s1 + $0xa0] sm:$0xff]   ;;  %v5379_v34 = vld [vmem:[%s6403_s1 + $0x68] sm:$0xff]  }
  0x45   : > { %4700 = vmatprep.subr.bf16.mxu0 %v5305_v35  ;;  %5036 = vmatpush3.bf16.msra.mxu1 %v5614_v15  ;;  %v5799_v15 = vld [vmem:[%s5592_s25 + $0x18] sm:$0xff]  }
  0x46   : > { %5029 = vmatprep.subr.bf16.mxu1 %v5624_v17 }
  0x48   : > { %4701 = vmatpush3.bf16.msra.mxu0 %v5305_v35  ;;  %v5381_v35 = vld [vmem:[%s6403_s1 + $0xa8] sm:$0xff]  }
  0x49   : > { %4878 = vmatprep.subr.bf16.mxu0 %v5310_v38  ;;  %5037 = vmatpush3.bf16.msra.mxu1 %v5624_v17  ;;  %v5805_v17 = vld [vmem:[%s5592_s25 + $0x20] sm:$0xff]  }
  0x4a   : > { %4623 = vmatmul.mubr.bf16.gmra.mrb[16].mxu1 %v5686_v36  ;;  %4734 = vmatprep.subr.bf16.mxu1 %v5328_v39 }
  0x4b   : > { %4703 = vmatmul.mubr.bf16.vlgmr.msra.gmra.mrb[0].mxu0 %v5309_v37  ;;  %4626 = vmatprep.mubr.bf16.mxu1 %v5698_v40  ;;  %v5877_v37 = vld [vmem:[%s5592_s25 + $0x48] sm:$0xff]  }
  0x4c   : > { %4879 = vmatpush3.bf16.msra.mxu0 %v5310_v38  ;;  %4706 = vmatprep.mubr.bf16.mxu0 %v5312_v41  ;;  %v5385_v38 = vld [vmem:[%s6403_s1 + $0x70] sm:$0xff]  }
  0x4d   : > { %4880 = vmatprep.subr.bf16.mxu0 %v5315_v42  ;;  %v5889_v41 = vld [vmem:[%s5592_s25 + $0x50] sm:$0xff]  }
  0x50   : > { %4881 = vmatpush3.bf16.msra.mxu0 %v5315_v42  ;;  %v5391_v42 = vld [vmem:[%s6403_s1 + $0x78] sm:$0xff]  }
  0x51   : > { %4882 = vmatprep.subr.bf16.mxu0 %v5320_v44 }
  0x52   : > { %4627 = vmatmul.mubr.bf16.gmra.mrb[20].mxu1 %v5708_v43 }
  0x53   : > { %4707 = vmatmul.mubr.bf16.gmra.mrb[4].mxu0 %v5314_v45  ;;  %4630 = vmatprep.mubr.bf16.mxu1 %v5715_v46  ;;  %v5397_v45 = vld [vmem:[%s6403_s1 + $0x1c0] sm:$0xff]  }
  0x54   : > { %4710 = vmatprep.mubr.bf16.mxu0 %v5317_v47  ;;  %4883 = vmatpush3.bf16.msra.mxu0 %v5320_v44  ;;  %v5902_v44 = vld [vmem:[%s5592_s25 + $0x58] sm:$0xff]   ;;  %v5911_v47 = vld [vmem:[%s5592_s25 + $0x60] sm:$0xff]  }
  0x55   : > { %4884 = vmatprep.subr.bf16.mxu0 %v5325_v48 }
  0x58   : > { %4885 = vmatpush3.bf16.msra.mxu0 %v5325_v48  ;;  %v5399_v48 = vld [vmem:[%s6403_s1 + $0x200] sm:$0xff]  }
  0x59   : > { %4886 = vmatprep.subr.bf16.mxu0 %v5329_v50 }
  0x5a   : > { %4631 = vmatmul.mubr.bf16.gmra.mrb[24].mxu1 %v5724_v49 }
  0x5b   : > { %4711 = vmatmul.mubr.bf16.gmra.mrb[8].mxu0 %v5319_v51  ;;  %4634 = vmatprep.mubr.bf16.mxu1 %v5321_v52  ;;  %v5927_v51 = vld [vmem:[%s5592_s25 + $0x68] sm:$0xff]   ;;  %v5930_v52 = vld [vmem:[%s5592_s25 + $0x70] sm:$0xff]  }
  0x5c   : > { %4714 = vmatprep.mubr.bf16.mxu0 %v5322_v53  ;;  %4887 = vmatpush3.bf16.msra.mxu0 %v5329_v50  ;;  %v5924_v50 = vld [vmem:[%s5592_s25 + $0x68] sm:$0xff]   ;;  %v5933_v53 = vld [vmem:[%s5592_s25 + $0x70] sm:$0xff]  }
  0x5d   : > { %4888 = vmatprep.subr.bf16.mxu0 %v5334_v54 }
  0x60   : > { %4889 = vmatpush3.bf16.msra.mxu0 %v5334_v54  ;;  %v5940_v54 = vld [vmem:[%s5592_s25 + $0x78] sm:$0xff]  }
  0x61   : > { %4890 = vmatprep.subr.bf16.mxu0 %v5339_v55 }
  0x62   : > { %4635 = vmatmul.mubr.bf16.gmra.mrb[28].mxu1 %v5323_v56  ;;  %v5388_v56 = vld [vmem:[%s5592_s25 + $0x80] sm:$0xff]  }
  0x63   : > { %4715 = vmatmul.mubr.bf16.gmra.mrb[12].mxu0 %v5324_v57  ;;  %4670 = vmatprep.mubr.bf16.mxu1 %v5658_v29  ;;  %v5849_v29 = vld [vmem:[%s5592_s25 + $0x38] sm:$0xff]   ;;  %v5389_v57 = vld [vmem:[%s5592_s25 + $0x80] sm:$0xff]  }
  0x64   : > { %4718 = vmatprep.mubr.bf16.mxu0 %v5326_v58  ;;  %4891 = vmatpush3.bf16.msra.mxu0 %v5339_v55  ;;  %v5943_v55 = vld [vmem:[%s5592_s25 + $0x78] sm:$0xff]   ;;  %v5390_v58 = vld [vmem:[%s5592_s25 + $0x88] sm:$0xff]  }
  0x65   : > { %4892 = vmatprep.subr.bf16.mxu0 %v5344_v59 }
  0x68   : > { %4893 = vmatpush3.bf16.msra.mxu0 %v5344_v59  ;;  %v5392_v59 = vld [vmem:[%s5592_s25 + $0x88] sm:$0xff]  }
  0x69   : > { %4926 = vmatprep.subr.bf16.mxu0 %v5351_v60 }
  0x6a   : > { %4671 = vmatmul.mubr.bf16.vlgmr.msra.gmra.mrb[16].mxu1 %v5671_v32  ;;  %v5858_v32 = vld [vmem:[%s5592_s25 + $0x40] sm:$0xff]  }
  0x6b   : > { %4719 = vmatmul.mubr.bf16.gmra.mrb[16].mxu0 %v5327_v61  ;;  %4735 = vmatpush3.bf16.msra.mxu1 %v5328_v39  ;;  %v5387_v39 = vld [vmem:[%s6403_s1 + $0xb0] sm:$0xff]   ;;  %v5395_v61 = vld [vmem:[%s5592_s25] sm:$0xff]  }
  0x6c   : > { %4736 = vmatprep.subr.bf16.mxu1 %v5330_v62  ;;  %4674 = vmatprep.mubr.bf16.mxu1 %v5675_v33  ;;  %v5861_v33 = vld [vmem:[%s5592_s25 + $0x40] sm:$0xff]  }
  0x6d   : > { %4722 = vmatprep.mubr.bf16.mxu0 %v5331_v63  ;;  %v5398_v63 = vld [vmem:[%s5592_s25 + $0x8] sm:$0xff]  }
  0x6f   : > { %4737 = vmatpush3.bf16.msra.mxu1 %v5330_v62  ;;  %v5396_v62 = vld [vmem:[%s5592_s25 + $0x8] sm:$0xff]  }
  0x70   : > { %4738 = vmatprep.subr.bf16.mxu1 %v5333_v0 }
  0x72   : > { %4675 = vmatmul.mubr.bf16.gmra.mrb[20].mxu1 %v5686_v36  ;;  %v5874_v36 = vld [vmem:[%s5592_s25 + $0x48] sm:$0xff]  }
  0x73   : > { %4723 = vmatmul.mubr.bf16.gmra.mrb[20].mxu0 %v5332_v1  ;;  %4739 = vmatpush3.bf16.msra.mxu1 %v5333_v0  ;;  %v5400_v0 = vld [vmem:[%s6403_s1 + $0x1c8] sm:$0xff]  }
  0x74   : > { %4740 = vmatprep.subr.bf16.mxu1 %v5335_v2  ;;  %4678 = vmatprep.mubr.bf16.mxu1 %v5698_v40  ;;  %v5886_v40 = vld [vmem:[%s5592_s25 + $0x50] sm:$0xff]   ;;  %v5401_v1 = vld [vmem:[%s6403_s1 + $0x208] sm:$0xff]  }
  0x75   : > { %4726 = vmatprep.mubr.bf16.mxu0 %v5336_v3  ;;  %v5403_v3 = vld [vmem:[%s6403_s1 + $0x210] sm:$0xff]  }
  0x77   : > { %4741 = vmatpush3.bf16.msra.mxu1 %v5335_v2  ;;  %v5402_v2 = vld [vmem:[%s6403_s1 + $0x1d0] sm:$0xff]  }
  0x78   : > { %4742 = vmatprep.subr.bf16.mxu1 %v5338_v4 }
  0x7a   : > { %4679 = vmatmul.mubr.bf16.gmra.mrb[24].mxu1 %v5708_v43  ;;  %v5393_v43 = vld [vmem:[%s6403_s1 + $0xb8] sm:$0xff]  }
  0x7b   : > { %4727 = vmatmul.mubr.bf16.gmra.mrb[24].mxu0 %v5337_v5  ;;  %4743 = vmatpush3.bf16.msra.mxu1 %v5338_v4  ;;  %v5404_v4 = vld [vmem:[%s6403_s1 + $0x1d8] sm:$0xff]  }
  0x7c   : > { %4744 = vmatprep.subr.bf16.mxu1 %v5340_v6  ;;  %4682 = vmatprep.mubr.bf16.mxu1 %v5715_v46  ;;  %v5908_v46 = vld [vmem:[%s5592_s25 + $0x58] sm:$0xff]  }
  0x7d   : > { %4730 = vmatprep.mubr.bf16.mxu0 %v5341_v7  ;;  %v5405_v5 = vld [vmem:[%s6403_s1 + $0x218] sm:$0xff]   ;;  %v5407_v7 = vld [vmem:[%s6403_s1 + $0x220] sm:$0xff]  }
  0x7f   : > { %4745 = vmatpush3.bf16.msra.mxu1 %v5340_v6  ;;  %v5406_v6 = vld [vmem:[%s6403_s1 + $0x1e0] sm:$0xff]  }
  0x80   : > { %4746 = vmatprep.subr.bf16.mxu1 %v5343_v8 }
  0x82   : > { %4683 = vmatmul.mubr.bf16.gmra.mrb[28].mxu1 %v5724_v49  ;;  %v5917_v49 = vld [vmem:[%s5592_s25 + $0x60] sm:$0xff]  }
  0x83   : > { %4731 = vmatmul.mubr.bf16.gmra.mrb[28].mxu0 %v5342_v9  ;;  %4747 = vmatpush3.bf16.msra.mxu1 %v5343_v8  ;;  %v5408_v8 = vld [vmem:[%s6403_s1 + $0x1e8] sm:$0xff]  }
  0x84   : > { %4748 = vmatprep.subr.bf16.mxu1 %v5345_v10  ;;  %4750 = vmatprep.mubr.bf16.mxu1 %v5784_v11  ;;  %v5409_v9 = vld [vmem:[%s6403_s1 + $0x228] sm:$0xff]  }
  0x85   : > { %4894 = vmatprep.mubr.bf16.mxu0 %v5787_v12 }
  0x87   : > { %4749 = vmatpush3.bf16.msra.mxu1 %v5345_v10  ;;  %v5410_v10 = vld [vmem:[%s6403_s1 + $0x1f0] sm:$0xff]  }
  0x88   : > { %4782 = vmatprep.subr.bf16.mxu1 %v5349_v13 }
  0x8a   : > { %4751 = vmatmul.mubr.bf16.vlgmr.msra.gmra.mrb[32].mxu1 %v5796_v14 }
  0x8b   : > { %4895 = vmatmul.mubr.bf16.vlgmr.msra.gmra.mrb[32].mxu0 %v5799_v15  ;;  %4783 = vmatpush3.bf16.msra.mxu1 %v5349_v13  ;;  %v5413_v13 = vld [vmem:[%s6403_s1 + $0x238] sm:$0xff]  }
  0x8c   : > { %4927 = vmatpush3.bf16.msra.mxu0 %v5351_v60  ;;  %4754 = vmatprep.mubr.bf16.mxu1 %v5802_v16  ;;  %v5394_v60 = vld [vmem:[%s5592_s25] sm:$0xff]  }
  0x8d   : > { %4898 = vmatprep.mubr.bf16.mxu0 %v5805_v17  ;;  %4784 = vmatprep.subr.bf16.mxu1 %v5355_v18 }
  0x8e   : > { %4928 = vmatprep.subr.bf16.mxu0 %v5357_v19 }
  0x8f   : > { %4785 = vmatpush3.bf16.msra.mxu1 %v5355_v18 }
  0x90   : > { %4929 = vmatpush3.bf16.msra.mxu0 %v5357_v19  ;;  %4786 = vmatprep.subr.bf16.mxu1 %v5361_v21  ;;  %v5415_v19 = vld [vmem:[%s5592_s25 + $0x20] sm:$0xff]  }
  0x91   : > { %4930 = vmatprep.subr.bf16.mxu0 %v5363_v22 }
  0x92   : > { %4755 = vmatmul.mubr.bf16.gmra.mrb[36].mxu1 %v5817_v20 }
  0x93   : > { %4899 = vmatmul.mubr.bf16.gmra.mrb[36].mxu0 %v5827_v23  ;;  %4758 = vmatprep.mubr.bf16.mxu1 %v5830_v24 }
  0x94   : > { %4902 = vmatprep.mubr.bf16.mxu0 %v5833_v25  ;;  %4787 = vmatpush3.bf16.msra.mxu1 %v5361_v21 }
  0x95   : > { %4931 = vmatpush3.bf16.msra.mxu0 %v5363_v22  ;;  %4788 = vmatprep.subr.bf16.mxu1 %v5367_v26  ;;  %v5416_v22 = vld [vmem:[%s5592_s25 + $0x28] sm:$0xff]  }
  0x96   : > { %4932 = vmatprep.subr.bf16.mxu0 %v5369_v27 }
  0x98   : > { %4789 = vmatpush3.bf16.msra.mxu1 %v5367_v26 }
  0x99   : > { %4933 = vmatpush3.bf16.msra.mxu0 %v5369_v27  ;;  %4790 = vmatprep.subr.bf16.mxu1 %v5373_v30  ;;  %v5419_v27 = vld [vmem:[%s5592_s25 + $0x30] sm:$0xff]  }
  0x9a   : > { %4759 = vmatmul.mubr.bf16.gmra.mrb[40].mxu1 %v5846_v28  ;;  %4934 = vmatprep.subr.bf16.mxu0 %v5375_v31 }
  0x9b   : > { %4903 = vmatmul.mubr.bf16.gmra.mrb[40].mxu0 %v5849_v29  ;;  %4762 = vmatprep.mubr.bf16.mxu1 %v5858_v32 }
  0x9c   : > { %4906 = vmatprep.mubr.bf16.mxu0 %v5861_v33  ;;  %4791 = vmatpush3.bf16.msra.mxu1 %v5373_v30  ;;  %v5420_v30 = vld [vmem:[%s5592_s25 + $0x38] sm:$0xff]  }
  0x9d   : > { %4935 = vmatpush3.bf16.msra.mxu0 %v5375_v31  ;;  %4792 = vmatprep.subr.bf16.mxu1 %v5379_v34 }
  0x9e   : > { %4936 = vmatprep.subr.bf16.mxu0 %v5381_v35 }
  0xa0   : > { %4793 = vmatpush3.bf16.msra.mxu1 %v5379_v34 }
  0xa1   : > { %4937 = vmatpush3.bf16.msra.mxu0 %v5381_v35  ;;  %4794 = vmatprep.subr.bf16.mxu1 %v5385_v38  ;;  %v5423_v35 = vld [vmem:[%s5592_s25 + $0x40] sm:$0xff]  }
  0xa2   : > { %4763 = vmatmul.mubr.bf16.gmra.mrb[44].mxu1 %v5874_v36  ;;  %4938 = vmatprep.subr.bf16.mxu0 %v5387_v39 }
  0xa3   : > { %4907 = vmatmul.mubr.bf16.gmra.mrb[44].mxu0 %v5877_v37  ;;  %4766 = vmatprep.mubr.bf16.mxu1 %v5886_v40 }
  0xa4   : > { %4910 = vmatprep.mubr.bf16.mxu0 %v5889_v41  ;;  %4795 = vmatpush3.bf16.msra.mxu1 %v5385_v38  ;;  %v5424_v38 = vld [vmem:[%s5592_s25 + $0x48] sm:$0xff]  }
  0xa5   : > { %4939 = vmatpush3.bf16.msra.mxu0 %v5387_v39  ;;  %4796 = vmatprep.subr.bf16.mxu1 %v5391_v42 }
  0xa6   : > { %4940 = vmatprep.subr.bf16.mxu0 %v5393_v43 }
  0xa8   : > { %4797 = vmatpush3.bf16.msra.mxu1 %v5391_v42 }
  0xa9   : > { %4941 = vmatpush3.bf16.msra.mxu0 %v5393_v43  ;;  %4830 = vmatprep.subr.bf16.mxu1 %v5397_v45  ;;  %v5427_v43 = vld [vmem:[%s5592_s25 + $0x50] sm:$0xff]  }
  0xaa   : > { %4767 = vmatmul.mubr.bf16.gmra.mrb[48].mxu1 %v5902_v44  ;;  %4974 = vmatprep.subr.bf16.mxu0 %v5399_v48 }
  0xab   : > { %4911 = vmatmul.mubr.bf16.gmra.mrb[48].mxu0 %v5908_v46  ;;  %4770 = vmatprep.mubr.bf16.mxu1 %v5911_v47 }
  0xac   : > { %4914 = vmatprep.mubr.bf16.mxu0 %v5917_v49 }
  0xb2   : > { %4771 = vmatmul.mubr.bf16.gmra.mrb[52].mxu1 %v5924_v50 }
  0xb3   : > { %4915 = vmatmul.mubr.bf16.gmra.mrb[52].mxu0 %v5927_v51  ;;  %4774 = vmatprep.mubr.bf16.mxu1 %v5930_v52 }
  0xb4   : > { %4918 = vmatprep.mubr.bf16.mxu0 %v5933_v53 }
  0xba   : > { %4775 = vmatmul.mubr.bf16.gmra.mrb[56].mxu1 %v5940_v54 }
  0xbb   : > { %4919 = vmatmul.mubr.bf16.gmra.mrb[56].mxu0 %v5943_v55  ;;  %4778 = vmatprep.mubr.bf16.mxu1 %v5388_v56 }
  0xbc   : > { %4922 = vmatprep.mubr.bf16.mxu0 %v5389_v57  ;;  %v5432_v57 = vld [vmem:[%s5592_s25 + $0x68] sm:$0xff]  }
  0xc2   : > { %4779 = vmatmul.mubr.bf16.gmra.mrb[60].mxu1 %v5390_v58 }
  0xc3   : > { %4923 = vmatmul.mubr.bf16.gmra.mrb[60].mxu0 %v5392_v59  ;;  %4798 = vmatprep.mubr.bf16.mxu1 %v5394_v60  ;;  %v5433_v60 = vld [vmem:[%s5592_s25 + $0x68] sm:$0xff]  }
  0xc4   : > { %4942 = vmatprep.mubr.bf16.mxu0 %v5395_v61  ;;  %v5434_v61 = vld [vmem:[%s5592_s25 + $0x70] sm:$0xff]  }
  0xca   : > { %4799 = vmatmul.mubr.bf16.vlgmr.msra.gmra.mrb[32].mxu1 %v5396_v62 }
  0xcb   : > { %4943 = vmatmul.mubr.bf16.vlgmr.msra.gmra.mrb[32].mxu0 %v5398_v63  ;;  %4831 = vmatpush3.bf16.msra.mxu1 %v5397_v45  ;;  %v5428_v45 = vld [vmem:[%s5592_s25 + $0x58] sm:$0xff]  }
  0xcc   : > { %4975 = vmatpush3.bf16.msra.mxu0 %v5399_v48  ;;  %4802 = vmatprep.mubr.bf16.mxu1 %v5784_v11  ;;  %v5411_v11 = vld [vmem:[%s6403_s1 + $0x230] sm:$0xff]   ;;  %v5429_v48 = vld [vmem:[%s5592_s25 + $0x58] sm:$0xff]  }
  0xcd   : > { %4946 = vmatprep.mubr.bf16.mxu0 %v5787_v12  ;;  %4832 = vmatprep.subr.bf16.mxu1 %v5400_v0  ;;  %v5412_v12 = vld [vmem:[%s6403_s1 + $0x1f8] sm:$0xff]  }
  0xce   : > { %4976 = vmatprep.subr.bf16.mxu0 %v5401_v1 }
  0xcf   : > { %4833 = vmatpush3.bf16.msra.mxu1 %v5400_v0  ;;  %v5435_v0 = vld [vmem:[%s5592_s25 + $0x70] sm:$0xff]  }
  0xd0   : > { %4977 = vmatpush3.bf16.msra.mxu0 %v5401_v1  ;;  %4834 = vmatprep.subr.bf16.mxu1 %v5402_v2 }
  0xd1   : > { %4978 = vmatprep.subr.bf16.mxu0 %v5403_v3 }
  0xd2   : > { %4803 = vmatmul.mubr.bf16.gmra.mrb[36].mxu1 %v5796_v14 }
  0xd3   : > { %4947 = vmatmul.mubr.bf16.gmra.mrb[36].mxu0 %v5799_v15  ;;  %4806 = vmatprep.mubr.bf16.mxu1 %v5802_v16 }
  0xd4   : > { %4950 = vmatprep.mubr.bf16.mxu0 %v5805_v17  ;;  %4835 = vmatpush3.bf16.msra.mxu1 %v5402_v2  ;;  %v5414_v17 = vld [vmem:[%s5592_s25 + $0x20] sm:$0xff]  }
  0xd5   : > { %4979 = vmatpush3.bf16.msra.mxu0 %v5403_v3  ;;  %4836 = vmatprep.subr.bf16.mxu1 %v5404_v4 }
  0xd6   : > { %4980 = vmatprep.subr.bf16.mxu0 %v5405_v5 }
  0xd8   : > { %4837 = vmatpush3.bf16.msra.mxu1 %v5404_v4 }
  0xd9   : > { %4981 = vmatpush3.bf16.msra.mxu0 %v5405_v5  ;;  %4838 = vmatprep.subr.bf16.mxu1 %v5406_v6  ;;  %v5436_v5 = vld [vmem:[%s5592_s25 + $0x78] sm:$0xff]  }
  0xda   : > { %4807 = vmatmul.mubr.bf16.gmra.mrb[40].mxu1 %v5817_v20  ;;  %4982 = vmatprep.subr.bf16.mxu0 %v5407_v7 }
  0xdb   : > { %4951 = vmatmul.mubr.bf16.gmra.mrb[40].mxu0 %v5827_v23  ;;  %4810 = vmatprep.mubr.bf16.mxu1 %v5830_v24  ;;  %v5417_v24 = vld [vmem:[%s5592_s25 + $0x28] sm:$0xff]  }
  0xdc   : > { %4954 = vmatprep.mubr.bf16.mxu0 %v5833_v25  ;;  %4839 = vmatpush3.bf16.msra.mxu1 %v5406_v6  ;;  %v5418_v25 = vld [vmem:[%s5592_s25 + $0x30] sm:$0xff]  }
  0xdd   : > { %4983 = vmatpush3.bf16.msra.mxu0 %v5407_v7  ;;  %4840 = vmatprep.subr.bf16.mxu1 %v5408_v8 }
  0xde   : > { %4984 = vmatprep.subr.bf16.mxu0 %v5409_v9 }
  0xe0   : > { %4841 = vmatpush3.bf16.msra.mxu1 %v5408_v8  ;;  %v5437_v8 = vld [vmem:[%s5592_s25 + $0x78] sm:$0xff]  }
  0xe1   : > { %4985 = vmatpush3.bf16.msra.mxu0 %v5409_v9  ;;  %4842 = vmatprep.subr.bf16.mxu1 %v5410_v10  ;;  %v5438_v9 = vld [vmem:[%s5592_s25 + $0x80] sm:$0xff]  }
  0xe2   : > { %4811 = vmatmul.mubr.bf16.gmra.mrb[44].mxu1 %v5846_v28  ;;  %4986 = vmatprep.subr.bf16.mxu0 %v5411_v11 }
  0xe3   : > { %4955 = vmatmul.mubr.bf16.gmra.mrb[44].mxu0 %v5849_v29  ;;  %4814 = vmatprep.mubr.bf16.mxu1 %v5858_v32  ;;  %v5421_v32 = vld [vmem:[%s5592_s25 + $0x38] sm:$0xff]  }
  0xe4   : > { %4958 = vmatprep.mubr.bf16.mxu0 %v5861_v33  ;;  %4843 = vmatpush3.bf16.msra.mxu1 %v5410_v10  ;;  %v5422_v33 = vld [vmem:[%s5592_s25 + $0x40] sm:$0xff]  }
  0xe5   : > { %4987 = vmatpush3.bf16.msra.mxu0 %v5411_v11  ;;  %4844 = vmatprep.subr.bf16.mxu1 %v5412_v12 }
  0xe6   : > { %4988 = vmatprep.subr.bf16.mxu0 %v5413_v13 }
  0xe8   : > { %4845 = vmatpush3.bf16.msra.mxu1 %v5412_v12  ;;  %v5439_v12 = vld [vmem:[%s5592_s25 + $0x80] sm:$0xff]  }
  0xe9   : > { %4989 = vmatpush3.bf16.msra.mxu0 %v5413_v13 }
  0xea   : > { %4815 = vmatmul.mubr.bf16.gmra.mrb[48].mxu1 %v5874_v36 }
  0xeb   : > { %4959 = vmatmul.mubr.bf16.gmra.mrb[48].mxu0 %v5877_v37  ;;  %4818 = vmatprep.mubr.bf16.mxu1 %v5886_v40  ;;  %v5425_v40 = vld [vmem:[%s5592_s25 + $0x48] sm:$0xff]  }
  0xec   : > { %4962 = vmatprep.mubr.bf16.mxu0 %v5889_v41  ;;  %v5426_v41 = vld [vmem:[%s5592_s25 + $0x50] sm:$0xff]  }
  0xf2   : > { %4819 = vmatmul.mubr.bf16.gmra.mrb[52].mxu1 %v5902_v44 }
  0xf3   : > { %4963 = vmatmul.mubr.bf16.gmra.mrb[52].mxu0 %v5908_v46  ;;  %4822 = vmatprep.mubr.bf16.mxu1 %v5911_v47 }
  0xf4   : > { %4966 = vmatprep.mubr.bf16.mxu0 %v5917_v49  ;;  %v5430_v49 = vld [vmem:[%s5592_s25 + $0x60] sm:$0xff]  }
  0xfa   : > { %4823 = vmatmul.mubr.bf16.gmra.mrb[56].mxu1 %v5924_v50 }
  0xfb   : > { %4967 = vmatmul.mubr.bf16.gmra.mrb[56].mxu0 %v5927_v51  ;;  %4826 = vmatprep.mubr.bf16.mxu1 %v5930_v52  ;;  %v5431_v52 = vld [vmem:[%s5592_s25 + $0x60] sm:$0xff]  }
  0xfc   : > { %4970 = vmatprep.mubr.bf16.mxu0 %v5933_v53 }
  0xfd   : > { %v4608_v14 = vpop.f32.mrb[0].mxu1 }
  0xfe   : > { %v573_v15 = vpop.f32.mrb[1].mxu1 }
  0xff   : > { %v4609_v16 = vpop.f32.mrb[2].mxu1 }
 0x100   : > { %v576_v18 = vpop.f32.mrb[3].mxu1 }
 0x102   : > { %4827 = vmatmul.mubr.bf16.gmra.mrb[60].mxu1 %v5940_v54 }
 0x103   : > { %4971 = vmatmul.mubr.bf16.gmra.mrb[60].mxu0 %v5943_v55  ;;  %4846 = vmatprep.mubr.bf16.mxu1 %v5414_v17  ;;  %v5440_v17 = vld [vmem:[%s5592_s25 + $0x88] sm:$0xff]  }
 0x104   : > { %4990 = vmatprep.mubr.bf16.mxu0 %v5415_v19 }
 0x105   : > { %v4612_v20 = vpop.f32.mrb[4].mxu1 }
 0x106   : > { %v589_v21 = vpop.f32.mrb[5].mxu1 }
 0x107   : > { %v4613_v23 = vpop.f32.mrb[6].mxu1 }
 0x108   : > { %v592_v26 = vpop.f32.mrb[7].mxu1 }
 0x10a   : > { %4847 = vmatmul.mubr.bf16.vlgmr.msra.gmra.mrb[32].mxu1 %v5416_v22 }
 0x10b   : > { %4991 = vmatmul.mubr.bf16.vlgmr.msra.gmra.mrb[32].mxu0 %v5417_v24  ;;  %4850 = vmatprep.mubr.bf16.mxu1 %v5418_v25  ;;  %v5443_v24 = vld [vmem:[%s5592_s25 + $0x90] sm:$0xff]  }
 0x10c   : > { %4994 = vmatprep.mubr.bf16.mxu0 %v5419_v27 }
 0x10d   : > { %v4616_v28 = vpop.f32.mrb[8].mxu1 }
 0x10e   : > { %v605_v29 = vpop.f32.mrb[9].mxu1 }
 0x10f   : > { %v4617_v31 = vpop.f32.mrb[10].mxu1 }
 0x110   : > { %v608_v34 = vpop.f32.mrb[11].mxu1 }
 0x112   : > { %4851 = vmatmul.mubr.bf16.gmra.mrb[36].mxu1 %v5420_v30 }
 0x113   : > { %4995 = vmatmul.mubr.bf16.gmra.mrb[36].mxu0 %v5421_v32  ;;  %4854 = vmatprep.mubr.bf16.mxu1 %v5422_v33 }
 0x114   : > { %4998 = vmatprep.mubr.bf16.mxu0 %v5423_v35  ;;  %v5445_v35 = vld [vmem:[%s5592_s25 + $0x98] sm:$0xff]  }
 0x115   : > { %v4620_v36 = vpop.f32.mrb[12].mxu1 }
 0x116   : > { %v6035_v37 = vpop.f32.mrb[13].mxu1 }
 0x117   : > { %v6038_v39 = vpop.f32.mrb[14].mxu1 }
 0x118   : > { %v6042_v42 = vpop.f32.mrb[15].mxu1 }
 0x11a   : > { %4855 = vmatmul.mubr.bf16.gmra.mrb[40].mxu1 %v5424_v38 }
 0x11b   : > { %4999 = vmatmul.mubr.bf16.gmra.mrb[40].mxu0 %v5425_v40  ;;  %4858 = vmatprep.mubr.bf16.mxu1 %v5426_v41 }
 0x11c   : > { %5002 = vmatprep.mubr.bf16.mxu0 %v5427_v43 }
 0x11e   : > { %v4704_v44 = vpop.f32.mrb[0].mxu0 }
 0x11f   : > { %v6046_v46 = vadd.f32 %v4704_v44, %v4608_v14  ;;  %v1148_v47 = vpop.f32.mrb[1].mxu0 }
 0x120   : > { %v6050_v50 = vadd.f32 %v1148_v47, %v573_v15  ;;  %v4705_v51 = vpop.f32.mrb[2].mxu0 }
 0x121   : > { %v6053_v53 = vadd.f32 %v4705_v51, %v4609_v16  ;;  %v1151_v54 = vpop.f32.mrb[3].mxu0 }
 0x122   : > { %v6055_v55 = vadd.f32 %v1151_v54, %v576_v18  ;;  %4859 = vmatmul.mubr.bf16.gmra.mrb[44].mxu1 %v5428_v45 }
 0x123   : > { %5003 = vmatmul.mubr.bf16.gmra.mrb[44].mxu0 %v5429_v48  ;;  %4862 = vmatprep.mubr.bf16.mxu1 %v5430_v49 }
 0x124   : > { %5006 = vmatprep.mubr.bf16.mxu0 %v5431_v52 }
 0x126   : > { %v4708_v56 = vpop.f32.mrb[4].mxu0 }
 0x127   : > { %v6058_v58 = vadd.f32 %v4708_v56, %v4612_v20  ;;  %v1164_v59 = vpop.f32.mrb[5].mxu0  ;;  %v5441_v20 = vld [vmem:[%s5592_s25 + $0x88] sm:$0xff]  }
 0x128   : > { %v6062_v62 = vadd.f32 %v1164_v59, %v589_v21  ;;  %v4709_v63 = vpop.f32.mrb[6].mxu0  ;;  %v5442_v21 = vld [vmem:[%s5592_s25 + $0x90] sm:$0xff]  }
 0x129   : > { %v6065_v1 = vadd.f32 %v4709_v63, %v4613_v23  ;;  %v1167_v2 = vpop.f32.mrb[7].mxu0 }
 0x12a   : > { %v6067_v3 = vadd.f32 %v1167_v2, %v592_v26  ;;  %4863 = vmatmul.mubr.bf16.gmra.mrb[48].mxu1 %v5432_v57 }
 0x12b   : > { %5007 = vmatmul.mubr.bf16.gmra.mrb[48].mxu0 %v5433_v60  ;;  %4866 = vmatprep.mubr.bf16.mxu1 %v5434_v61 }
 0x12c   : > { %5010 = vmatprep.mubr.bf16.mxu0 %v5435_v0 }
 0x12e   : > { %v4712_v4 = vpop.f32.mrb[8].mxu0 }
 0x12f   : > { %v6070_v6 = vadd.f32 %v4712_v4, %v4616_v28  ;;  %v1180_v7 = vpop.f32.mrb[9].mxu0 }
 0x130   : > { %v6074_v10 = vadd.f32 %v1180_v7, %v605_v29  ;;  %v4713_v11 = vpop.f32.mrb[10].mxu0 }
 0x131   : > { %v6077_v13 = vadd.f32 %v4713_v11, %v4617_v31  ;;  %v1183_v14 = vpop.f32.mrb[11].mxu0  ;;  %v5444_v31 = vld [vmem:[%s5592_s25 + $0x98] sm:$0xff]   ;;  %s4066_s25 = sshll.u32 %s6419_s12, 5 }
 0x132   : > { %v6079_v15 = vadd.f32 %v1183_v14, %v608_v34  ;;  %4867 = vmatmul.mubr.bf16.gmra.mrb[52].mxu1 %v5436_v5  ;;  %s222_s10 = sadd.s32 %s4067_s9, %s4066_s25 }
 0x133   : > { %5011 = vmatmul.mubr.bf16.gmra.mrb[52].mxu0 %v5437_v8  ;;  %4870 = vmatprep.mubr.bf16.mxu1 %v5438_v9  ;;  %s4068_s11 = sshll.u32 %s222_s10, 3 }
 0x134   : > { %5014 = vmatprep.mubr.bf16.mxu0 %v5439_v12  ;;  %s6170_s21 = scalar_lea.vmem %s6405_s3, %s4068_s11 }
 0x136   : > { %v4716_v16 = vpop.f32.mrb[12].mxu0 }
 0x137   : > { %v6082_v18 = vadd.f32 %v4716_v16, %v4620_v36  ;;  %v1196_v19 = vpop.f32.mrb[13].mxu0 }
 0x138   : > { %v6087_v22 = vadd.f32 %v1196_v19, %v6035_v37  ;;  %v4717_v23 = vpop.f32.mrb[14].mxu0 }
 0x139   : > { %v6091_v25 = vadd.f32 %v4717_v23, %v6038_v39  ;;  %v1199_v26 = vpop.f32.mrb[15].mxu0 }
 0x13a   : > { %v6094_v27 = vadd.f32 %v1199_v26, %v6042_v42  ;;  %4871 = vmatmul.mubr.bf16.gmra.mrb[56].mxu1 %v5440_v17 }
 0x13b   : > { %5015 = vmatmul.mubr.bf16.gmra.mrb[56].mxu0 %v5441_v20  ;;  %4874 = vmatprep.mubr.bf16.mxu1 %v5442_v21 }
 0x13c   : > { %5018 = vmatprep.mubr.bf16.mxu0 %v5443_v24 }
 0x13d   : > { %v4672_v28 = vpop.f32.mrb[16].mxu1 }
 0x13e   : > { %v4720_v29 = vpop.f32.mrb[16].mxu0  ;;  %v858_v30 = vpop.f32.mrb[17].mxu1 }
 0x13f   : > { %v6097_v32 = vadd.f32 %v4720_v29, %v4672_v28  ;;  %v1212_v33 = vpop.f32.mrb[17].mxu0  ;;  %v4673_v34 = vpop.f32.mrb[18].mxu1 }
 0x140   : > { %v6100_v36 = vadd.f32 %v1212_v33, %v858_v30  ;;  %v4721_v37 = vpop.f32.mrb[18].mxu0  ;;  %v861_v38 = vpop.f32.mrb[19].mxu1  ;;  %v3660_v30 = vlaneseq }
 0x141   : > { %v6102_v39 = vadd.f32 %v4721_v37, %v4673_v34  ;;  %v1215_v40 = vpop.f32.mrb[19].mxu0 }
 0x142   : > { %v6104_v41 = vadd.f32 %v1215_v40, %v861_v38  ;;  %4875 = vmatmul.mubr.bf16.gmra.mrb[60].mxu1 %v5444_v31  ;;  %v6130_v31 = vshrl.u32 %v3660_v30, 7 }
 0x143   : > { %5019 = vmatmul.mubr.bf16.gmra.mrb[60].mxu0 %v5445_v35 }
 0x144   : > { %vm3662_vm0 = vcmp.lt.s32.totalorder %v6130_v31, 7  ;;  %vm3791_vm1 = vcmp.lt.s32.totalorder %v6130_v31, 6 }
 0x145   : > { %v4676_v42 = vpop.f32.mrb[20].mxu1 }
 0x146   : > { %v4724_v43 = vpop.f32.mrb[20].mxu0  ;;  %v874_v44 = vpop.f32.mrb[21].mxu1 }
 0x147   : > { %v6106_v45 = vadd.f32 %v4724_v43, %v4676_v42  ;;  %v1228_v47 = vpop.f32.mrb[21].mxu0  ;;  %v4677_v48 = vpop.f32.mrb[22].mxu1 }
 0x148   : > { %v6108_v49 = vadd.f32 %v1228_v47, %v874_v44  ;;  %v4725_v51 = vpop.f32.mrb[22].mxu0  ;;  %v877_v52 = vpop.f32.mrb[23].mxu1 }
 0x149   : > { %v6110_v54 = vadd.f32 %v4725_v51, %v4677_v48  ;;  %v1231_v56 = vpop.f32.mrb[23].mxu0 }
 0x14a   : > { %v6112_v57 = vadd.f32 %v1231_v56, %v877_v52 }
 0x14d   : > { %v4680_v59 = vpop.f32.mrb[24].mxu1 }
 0x14e   : > { %v4728_v60 = vpop.f32.mrb[24].mxu0  ;;  %v890_v61 = vpop.f32.mrb[25].mxu1 }
 0x14f   : > { %v6114_v63 = vadd.f32 %v4728_v60, %v4680_v59  ;;  %v1244_v0 = vpop.f32.mrb[25].mxu0  ;;  %v4681_v2 = vpop.f32.mrb[26].mxu1 }
 0x150   : > { %v6116_v4 = vadd.f32 %v1244_v0, %v890_v61  ;;  %v4729_v5 = vpop.f32.mrb[26].mxu0  ;;  %v893_v7 = vpop.f32.mrb[27].mxu1 }
 0x151   : > { %v6118_v8 = vadd.f32 %v4729_v5, %v4681_v2  ;;  %v1247_v9 = vpop.f32.mrb[27].mxu0 }
 0x152   : > { %v6120_v11 = vadd.f32 %v1247_v9, %v893_v7  ;;  %v6156_v9 = vld [vmem:[%s6404_s2] ss:$0 sm:$0xff] }
 0x155   : > { %v4684_v12 = vpop.f32.mrb[28].mxu1 }
 0x156   : > { %v4732_v14 = vpop.f32.mrb[28].mxu0  ;;  %v906_v16 = vpop.f32.mrb[29].mxu1 }
 0x157   : > { %v6122_v17 = vadd.f32 %v4732_v14, %v4684_v12  ;;  %v1260_v19 = vpop.f32.mrb[29].mxu0  ;;  %v4685_v20 = vpop.f32.mrb[30].mxu1 }
 0x158   : > { %v6124_v21 = vadd.f32 %v1260_v19, %v906_v16  ;;  %v4733_v23 = vpop.f32.mrb[30].mxu0  ;;  %v909_v24 = vpop.f32.mrb[31].mxu1 }
 0x159   : > { %v6126_v26 = vadd.f32 %v4733_v23, %v4685_v20  ;;  %v1263_v28 = vpop.f32.mrb[31].mxu0 }
 0x15a   : > { %v6128_v29 = vadd.f32 %v1263_v28, %v909_v24 }
 0x1dd   : > { %v4848_v33 = vpop.f32.mrb[32].mxu1 }
 0x1de   : > { %v4992_v34 = vpop.f32.mrb[32].mxu0  ;;  %v6132_v35 = vpop.f32.mrb[33].mxu1  ;;  %v3630_v40 = vrot.slane %v4848_v33, 1 }
 0x1df   : > { %v6134_v37 = vpop.f32.mrb[33].mxu0  ;;  %v4849_v38 = vpop.f32.mrb[34].mxu1  ;;  %v3761_v47 = vrot.slane %v4992_v34, 2  ;;  %v3628_v48 = vrot.slane %v6132_v35, 1 }
 0x1e0   : > { %v3631_v42 = vrot.slane %v4849_v38, 1  ;;  %v4993_v43 = vpop.f32.mrb[34].mxu0  ;;  %v2229_v44 = vpop.f32.mrb[35].mxu1  ;;  %v3759_v59 = vrot.slane %v6134_v37, 2 }
 0x1e1   : > { %v3762_v51 = vrot.slane %v4993_v43, 2  ;;  %v3629_v52 = vrot.slane %v2229_v44, 1  ;;  %v3308_v56 = vpop.f32.mrb[35].mxu0 }
 0x1e2   : > { %v3691_v60 = vsel %vm3662_vm0, %v3630_v40, %v3631_v42  ;;  %v3760_v61 = vrot.slane %v3308_v56, 2 }
 0x1e3   : > { %v3697_v0 = vadd.f32 %v6046_v46, %v3691_v60  ;;  %v3820_v2 = vsel %vm3791_vm1, %v3761_v47, %v3762_v51  ;;  %v3692_v5 = vsel %vm3662_vm0, %v3629_v52, %v3630_v40  ;;  %v3693_v7 = vsel %vm3662_vm0, %v3628_v48, %v3629_v52 }
 0x1e4   : > { %v3695_v12 = vadd.f32 %v6050_v50, %v3693_v7  ;;  %v3696_v46 = vadd.f32 %v6055_v55, %v3692_v5  ;;  %v3821_v14 = vsel %vm3791_vm1, %v3760_v61, %v3761_v47  ;;  %v3822_v16 = vsel %vm3791_vm1, %v3759_v59, %v3760_v61 }
 0x1e5   : > { %v3826_v19 = vadd.f32 %v3820_v2, %v3697_v0  ;;  %v4852_v20 = vpop.f32.mrb[36].mxu1 }
 0x1e6   : > { %v3824_v23 = vadd.f32 %v3822_v16, %v3695_v12  ;;  %v3825_v24 = vadd.f32 %v3821_v14, %v3696_v46  ;;  %v4996_v28 = vpop.f32.mrb[36].mxu0  ;;  %v2242_v30 = vpop.f32.mrb[37].mxu1  ;;  %v3634_v50 = vrot.slane %v4852_v20, 1 }
 0x1e7   : > { %v3865_v33 = vadd.f32 %v6156_v9, %v3826_v19  ;;  %v3765_v34 = vrot.slane %v4996_v28, 2  ;;  %v3632_v55 = vrot.slane %v2242_v30, 1  ;;  %v3321_v38 = vpop.f32.mrb[37].mxu0  ;;  %v4853_v40 = vpop.f32.mrb[38].mxu1 }
 0x1e8   : > { %v3863_v43 = vadd.f32 %v6156_v9, %v3824_v23  ;;  %v3864_v44 = vadd.f32 %v6156_v9, %v3825_v24  ;;  %v3763_v47 = vrot.slane %v3321_v38, 2  ;;  %v3635_v52 = vrot.slane %v4853_v40, 1  ;;  %v4997_v56 = vpop.f32.mrb[38].mxu0  ;;  %v2245_v60 = vpop.f32.mrb[39].mxu1 }
 0x1e9   : > { %v3897_v61 = vmax.f32 %v3865_v33, 0.0  ;;  %v3690_v0 = vsel %vm3662_vm0, %v3631_v42, %v3632_v55  ;;  %v3766_v2 = vrot.slane %v4997_v56, 2  ;;  %v3633_v5 = vrot.slane %v2245_v60, 1  ;;  %v3324_v7 = vpop.f32.mrb[39].mxu0 }
 0x1ea   : > { %v3895_v12 = vmax.f32 %v3863_v43, 0.0  ;;  %v3896_v46 = vmax.f32 %v3864_v44, 0.0  ;;  %v3698_v14 = vadd.f32 %v6053_v53, %v3690_v0  ;;  %v3819_v16 = vsel %vm3791_vm1, %v3762_v51, %v3763_v47 }
 0x1eb   : > { %3929 = vst [vmem:[%s6170_s21 + $0x10] sm:$0xff] %v3897_v61  ;;  %v3687_v19 = vsel %vm3662_vm0, %v3634_v50, %v3635_v52  ;;  %v3816_v20 = vsel %vm3791_vm1, %v3765_v34, %v3766_v2  ;;  %v3688_v42 = vsel %vm3662_vm0, %v3633_v5, %v3634_v50  ;;  %v3689_v23 = vsel %vm3662_vm0, %v3632_v55, %v3633_v5 }
 0x1ec   : > { %3927 = vst [vmem:[%s6170_s21] sm:$0xff] %v3895_v12  ;;  %3928 = vst [vmem:[%s6170_s21 + $0x8] sm:$0xff] %v3896_v46  ;;  %v3827_v24 = vadd.f32 %v3819_v16, %v3698_v14  ;;  %v3701_v53 = vadd.f32 %v6058_v58, %v3687_v19  ;;  %v3699_v51 = vadd.f32 %v6062_v62, %v3689_v23  ;;  %v3764_v30 = vrot.slane %v3324_v7, 2 }
 0x1ed   : > { %v3700_v28 = vadd.f32 %v6067_v3, %v3688_v42  ;;  %v4856_v33 = vpop.f32.mrb[40].mxu1 }
 0x1ee   : > { %v3866_v38 = vadd.f32 %v6156_v9, %v3827_v24  ;;  %v3830_v40 = vadd.f32 %v3816_v20, %v3701_v53  ;;  %v3638_v43 = vrot.slane %v4856_v33, 1  ;;  %v5000_v44 = vpop.f32.mrb[40].mxu0  ;;  %v2258_v50 = vpop.f32.mrb[41].mxu1  ;;  %v3817_v55 = vsel %vm3791_vm1, %v3764_v30, %v3765_v34 }
 0x1ef   : > { %v3818_v56 = vsel %vm3791_vm1, %v3763_v47, %v3764_v30  ;;  %v3769_v58 = vrot.slane %v5000_v44, 2  ;;  %v3636_v60 = vrot.slane %v2258_v50, 1  ;;  %v3337_v62 = vpop.f32.mrb[41].mxu0  ;;  %v4857_v61 = vpop.f32.mrb[42].mxu1  ;;  %v3829_v7 = vadd.f32 %v3817_v55, %v3700_v28 }
 0x1f0   : > { %v3898_v3 = vmax.f32 %v3866_v38, 0.0  ;;  %v3869_v0 = vadd.f32 %v6156_v9, %v3830_v40  ;;  %v3828_v5 = vadd.f32 %v3818_v56, %v3699_v51  ;;  %v5001_v12 = vpop.f32.mrb[42].mxu0  ;;  %v2261_v46 = vpop.f32.mrb[43].mxu1  ;;  %v3767_v34 = vrot.slane %v3337_v62, 2 }
 0x1f1   : > { %v3686_v14 = vsel %vm3662_vm0, %v3635_v52, %v3636_v60  ;;  %v3639_v16 = vrot.slane %v4857_v61, 1  ;;  %v3770_v19 = vrot.slane %v5001_v12, 2  ;;  %v3340_v47 = vpop.f32.mrb[43].mxu0  ;;  %v3868_v23 = vadd.f32 %v6156_v9, %v3829_v7 }
 0x1f2   : > { %3930 = vst [vmem:[%s6170_s21 + $0x18] sm:$0xff] %v3898_v3  ;;  %v3901_v20 = vmax.f32 %v3869_v0, 0.0  ;;  %v3867_v42 = vadd.f32 %v6156_v9, %v3828_v5  ;;  %v3702_v24 = vadd.f32 %v6065_v1, %v3686_v14  ;;  %v3815_v53 = vsel %vm3791_vm1, %v3766_v2, %v3767_v34 }
 0x1f3   : > { %v3683_v52 = vsel %vm3662_vm0, %v3638_v43, %v3639_v16  ;;  %v3812_v51 = vsel %vm3791_vm1, %v3769_v58, %v3770_v19  ;;  %v3637_v28 = vrot.slane %v2261_v46, 1  ;;  %v3900_v33 = vmax.f32 %v3868_v23, 0.0 }
 0x1f4   : > { %3933 = vst [vmem:[%s6170_s21 + $0x30] sm:$0xff] %v3901_v20  ;;  %v3899_v30 = vmax.f32 %v3867_v42, 0.0  ;;  %v3831_v38 = vadd.f32 %v3815_v53, %v3702_v24  ;;  %v3705_v40 = vadd.f32 %v6070_v6, %v3683_v52  ;;  %v3768_v2 = vrot.slane %v3340_v47, 2 }
 0x1f5   : > { %v3684_v44 = vsel %vm3662_vm0, %v3637_v28, %v3638_v43  ;;  %v3685_v1 = vsel %vm3662_vm0, %v3636_v60, %v3637_v28  ;;  %v4860_v50 = vpop.f32.mrb[44].mxu1  ;;  %3932 = vst [vmem:[%s6170_s21 + $0x28] sm:$0xff] %v3900_v33 }
 0x1f6   : > { %3931 = vst [vmem:[%s6170_s21 + $0x20] sm:$0xff] %v3899_v30  ;;  %v3870_v55 = vadd.f32 %v6156_v9, %v3831_v38  ;;  %v3834_v56 = vadd.f32 %v3812_v51, %v3705_v40  ;;  %v3703_v62 = vadd.f32 %v6074_v10, %v3685_v1  ;;  %v3704_v61 = vadd.f32 %v6079_v15, %v3684_v44  ;;  %v5004_v3 = vpop.f32.mrb[44].mxu0  ;;  %v2274_v0 = vpop.f32.mrb[45].mxu1 }
 0x1f7   : > { %v3813_v6 = vsel %vm3791_vm1, %v3768_v2, %v3769_v58  ;;  %v3814_v43 = vsel %vm3791_vm1, %v3767_v34, %v3768_v2  ;;  %v3642_v60 = vrot.slane %v4860_v50, 1  ;;  %v3773_v5 = vrot.slane %v5004_v3, 2  ;;  %v3353_v7 = vpop.f32.mrb[45].mxu0  ;;  %v4861_v12 = vpop.f32.mrb[46].mxu1 }
 0x1f8   : > { %v3902_v46 = vmax.f32 %v3870_v55, 0.0  ;;  %v3873_v14 = vadd.f32 %v6156_v9, %v3834_v56  ;;  %v3832_v47 = vadd.f32 %v3814_v43, %v3703_v62  ;;  %v3833_v10 = vadd.f32 %v3813_v6, %v3704_v61  ;;  %v5005_v20 = vpop.f32.mrb[46].mxu0  ;;  %v2277_v15 = vpop.f32.mrb[47].mxu1 }
 0x1f9   : > { %v3640_v42 = vrot.slane %v2274_v0, 1  ;;  %v3771_v23 = vrot.slane %v3353_v7, 2  ;;  %v3643_v24 = vrot.slane %v4861_v12, 1  ;;  %v3774_v58 = vrot.slane %v5005_v20, 2  ;;  %v3356_v53 = vpop.f32.mrb[47].mxu0 }
 0x1fa   : > { %3934 = vst [vmem:[%s6170_s21 + $0x38] sm:$0xff] %v3902_v46  ;;  %v3905_v34 = vmax.f32 %v3873_v14, 0.0  ;;  %v3871_v52 = vadd.f32 %v6156_v9, %v3832_v47  ;;  %v3872_v51 = vadd.f32 %v6156_v9, %v3833_v10  ;;  %v3641_v28 = vrot.slane %v2277_v15, 1 }
 0x1fb   : > { %v3682_v30 = vsel %vm3662_vm0, %v3639_v16, %v3640_v42  ;;  %v3811_v33 = vsel %vm3791_vm1, %v3770_v19, %v3771_v23  ;;  %v3679_v38 = vsel %vm3662_vm0, %v3642_v60, %v3643_v24  ;;  %v3808_v40 = vsel %vm3791_vm1, %v3773_v5, %v3774_v58 }
 0x1fc   : > { %3937 = vst [vmem:[%s6170_s21 + $0x50] sm:$0xff] %v3905_v34  ;;  %v3903_v44 = vmax.f32 %v3871_v52, 0.0  ;;  %v3904_v1 = vmax.f32 %v3872_v51, 0.0  ;;  %v3706_v2 = vadd.f32 %v6077_v13, %v3682_v30  ;;  %v3709_v50 = vadd.f32 %v6082_v18, %v3679_v38 }
 0x1fd   : > { %v3680_v55 = vsel %vm3662_vm0, %v3641_v28, %v3642_v60  ;;  %v3681_v16 = vsel %vm3662_vm0, %v3640_v42, %v3641_v28  ;;  %v3772_v19 = vrot.slane %v3356_v53, 2  ;;  %v4864_v56 = vpop.f32.mrb[48].mxu1 }
 0x1fe   : > { %3935 = vst [vmem:[%s6170_s21 + $0x40] sm:$0xff] %v3903_v44  ;;  %3936 = vst [vmem:[%s6170_s21 + $0x48] sm:$0xff] %v3904_v1  ;;  %v3835_v62 = vadd.f32 %v3811_v33, %v3706_v2  ;;  %v3838_v61 = vadd.f32 %v3808_v40, %v3709_v50  ;;  %v3707_v3 = vadd.f32 %v6087_v22, %v3681_v16  ;;  %v5008_v6 = vpop.f32.mrb[48].mxu0  ;;  %v2290_v13 = vpop.f32.mrb[49].mxu1  ;;  %v3646_v60 = vrot.slane %v4864_v56, 1 }
 0x1ff   : > { %v3708_v0 = vadd.f32 %v6094_v27, %v3680_v55  ;;  %v3809_v18 = vsel %vm3791_vm1, %v3772_v19, %v3773_v5  ;;  %v3810_v43 = vsel %vm3791_vm1, %v3771_v23, %v3772_v19  ;;  %v3777_v7 = vrot.slane %v5008_v6, 2  ;;  %v3369_v12 = vpop.f32.mrb[49].mxu0  ;;  %v4865_v46 = vpop.f32.mrb[50].mxu1 }
 0x200   : > { %v3874_v14 = vadd.f32 %v6156_v9, %v3835_v62  ;;  %v3877_v47 = vadd.f32 %v6156_v9, %v3838_v61  ;;  %v3836_v10 = vadd.f32 %v3810_v43, %v3707_v3  ;;  %v5009_v27 = vpop.f32.mrb[50].mxu0  ;;  %v2293_v20 = vpop.f32.mrb[51].mxu1  ;;  %v3644_v15 = vrot.slane %v2290_v13, 1 }
 0x201   : > { %v3837_v22 = vadd.f32 %v3809_v18, %v3708_v0  ;;  %v3775_v42 = vrot.slane %v3369_v12, 2  ;;  %v3647_v5 = vrot.slane %v4865_v46, 1  ;;  %v3778_v53 = vrot.slane %v5009_v27, 2  ;;  %v3372_v34 = vpop.f32.mrb[51].mxu0 }
 0x202   : > { %v3906_v23 = vmax.f32 %v3874_v14, 0.0  ;;  %v3909_v52 = vmax.f32 %v3877_v47, 0.0  ;;  %v3875_v51 = vadd.f32 %v6156_v9, %v3836_v10  ;;  %v3678_v30 = vsel %vm3662_vm0, %v3643_v24, %v3644_v15 }
 0x203   : > { %v3876_v28 = vadd.f32 %v6156_v9, %v3837_v22  ;;  %v3807_v33 = vsel %vm3791_vm1, %v3774_v58, %v3775_v42  ;;  %v3675_v38 = vsel %vm3662_vm0, %v3646_v60, %v3647_v5  ;;  %v3804_v40 = vsel %vm3791_vm1, %v3777_v7, %v3778_v53 }
 0x204   : > { %3938 = vst [vmem:[%s6170_s21 + $0x58] sm:$0xff] %v3906_v23  ;;  %3941 = vst [vmem:[%s6170_s21 + $0x70] sm:$0xff] %v3909_v52  ;;  %v3907_v44 = vmax.f32 %v3875_v51, 0.0  ;;  %v3710_v2 = vadd.f32 %v6091_v25, %v3678_v30  ;;  %v3713_v50 = vadd.f32 %v6097_v32, %v3675_v38  ;;  %v3645_v55 = vrot.slane %v2293_v20, 1 }
 0x205   : > { %v3908_v1 = vmax.f32 %v3876_v28, 0.0  ;;  %v3776_v16 = vrot.slane %v3372_v34, 2  ;;  %v4868_v24 = vpop.f32.mrb[52].mxu1 }
 0x206   : > { %3939 = vst [vmem:[%s6170_s21 + $0x60] sm:$0xff] %v3907_v44  ;;  %v3839_v58 = vadd.f32 %v3807_v33, %v3710_v2  ;;  %v3842_v19 = vadd.f32 %v3804_v40, %v3713_v50  ;;  %v3650_v56 = vrot.slane %v4868_v24, 1  ;;  %v5012_v62 = vpop.f32.mrb[52].mxu0  ;;  %v2306_v61 = vpop.f32.mrb[53].mxu1  ;;  %v3676_v3 = vsel %vm3662_vm0, %v3645_v55, %v3646_v60 }
 0x207   : > { %3940 = vst [vmem:[%s6170_s21 + $0x68] sm:$0xff] %v3908_v1  ;;  %v3677_v0 = vsel %vm3662_vm0, %v3644_v15, %v3645_v55  ;;  %v3805_v25 = vsel %vm3791_vm1, %v3776_v16, %v3777_v7  ;;  %v3806_v32 = vsel %vm3791_vm1, %v3775_v42, %v3776_v16  ;;  %v3385_v6 = vpop.f32.mrb[53].mxu0  ;;  %v4869_v13 = vpop.f32.mrb[54].mxu1  ;;  %v3712_v46 = vadd.f32 %v6104_v41, %v3676_v3 }
 0x208   : > { %v3878_v18 = vadd.f32 %v6156_v9, %v3839_v58  ;;  %v3881_v43 = vadd.f32 %v6156_v9, %v3842_v19  ;;  %v3711_v12 = vadd.f32 %v6100_v36, %v3677_v0  ;;  %v5013_v60 = vpop.f32.mrb[54].mxu0  ;;  %v2309_v14 = vpop.f32.mrb[55].mxu1  ;;  %v3781_v47 = vrot.slane %v5012_v62, 2 }
 0x209   : > { %v3648_v10 = vrot.slane %v2306_v61, 1  ;;  %v3779_v7 = vrot.slane %v3385_v6, 2  ;;  %v3651_v22 = vrot.slane %v4869_v13, 1  ;;  %v3388_v27 = vpop.f32.mrb[55].mxu0  ;;  %v3841_v34 = vadd.f32 %v3805_v25, %v3712_v46 }
 0x20a   : > { %v3910_v20 = vmax.f32 %v3878_v18, 0.0  ;;  %v3913_v15 = vmax.f32 %v3881_v43, 0.0  ;;  %v3840_v42 = vadd.f32 %v3806_v32, %v3711_v12  ;;  %v3782_v52 = vrot.slane %v5013_v60, 2 }
 0x20b   : > { %v3674_v23 = vsel %vm3662_vm0, %v3647_v5, %v3648_v10  ;;  %v3803_v36 = vsel %vm3791_vm1, %v3778_v53, %v3779_v7  ;;  %v3671_v41 = vsel %vm3662_vm0, %v3650_v56, %v3651_v22  ;;  %v3880_v28 = vadd.f32 %v6156_v9, %v3841_v34 }
 0x20c   : > { %3942 = vst [vmem:[%s6170_s21 + $0x78] sm:$0xff] %v3910_v20  ;;  %3945 = vst [vmem:[%s6170_s21 + $0x90] sm:$0xff] %v3913_v15  ;;  %v3879_v51 = vadd.f32 %v6156_v9, %v3840_v42  ;;  %v3714_v30 = vadd.f32 %v6102_v39, %v3674_v23  ;;  %v3717_v33 = vadd.f32 %v6106_v45, %v3671_v41  ;;  %v3649_v38 = vrot.slane %v2309_v14, 1 }
 0x20d   : > { %v3800_v5 = vsel %vm3791_vm1, %v3781_v47, %v3782_v52  ;;  %v3780_v53 = vrot.slane %v3388_v27, 2  ;;  %v4872_v40 = vpop.f32.mrb[56].mxu1  ;;  %v3912_v1 = vmax.f32 %v3880_v28, 0.0 }
 0x20e   : > { %v3911_v44 = vmax.f32 %v3879_v51, 0.0  ;;  %v3843_v2 = vadd.f32 %v3803_v36, %v3714_v30  ;;  %v3846_v50 = vadd.f32 %v3800_v5, %v3717_v33  ;;  %v5016_v55 = vpop.f32.mrb[56].mxu0  ;;  %v2322_v16 = vpop.f32.mrb[57].mxu1  ;;  %v3672_v24 = vsel %vm3662_vm0, %v3649_v38, %v3650_v56 }
 0x20f   : > { %v3673_v39 = vsel %vm3662_vm0, %v3648_v10, %v3649_v38  ;;  %v3801_v45 = vsel %vm3791_vm1, %v3780_v53, %v3781_v47  ;;  %v3802_v58 = vsel %vm3791_vm1, %v3779_v7, %v3780_v53  ;;  %v3401_v19 = vpop.f32.mrb[57].mxu0  ;;  %v6305_v62 = vpop.f32.mrb[58].mxu1  ;;  %3944 = vst [vmem:[%s6170_s21 + $0x88] sm:$0xff] %v3912_v1  ;;  %v3716_v0 = vadd.f32 %v6112_v57, %v3672_v24 }
 0x210   : > { %3943 = vst [vmem:[%s6170_s21 + $0x80] sm:$0xff] %v3911_v44  ;;  %v3882_v61 = vadd.f32 %v6156_v9, %v3843_v2  ;;  %v3885_v3 = vadd.f32 %v6156_v9, %v3846_v50  ;;  %v3715_v56 = vadd.f32 %v6108_v49, %v3673_v39  ;;  %v5017_v25 = vpop.f32.mrb[58].mxu0  ;;  %v2325_v32 = vpop.f32.mrb[59].mxu1  ;;  %v3654_v6 = vrot.slane %v4872_v40, 1 }
 0x211   : > { %v3785_v13 = vrot.slane %v5016_v55, 2  ;;  %v3652_v18 = vrot.slane %v2322_v16, 1  ;;  %v3783_v43 = vrot.slane %v3401_v19, 2  ;;  %v3404_v12 = vpop.f32.mrb[59].mxu0  ;;  %v3845_v47 = vadd.f32 %v3801_v45, %v3716_v0 }
 0x212   : > { %v3914_v46 = vmax.f32 %v3882_v61, 0.0  ;;  %v3917_v60 = vmax.f32 %v3885_v3, 0.0  ;;  %v3844_v14 = vadd.f32 %v3802_v58, %v3715_v56  ;;  %v3655_v57 = vrot.slane %v6305_v62, 1 }
 0x213   : > { %v3670_v10 = vsel %vm3662_vm0, %v3651_v22, %v3652_v18  ;;  %v3799_v49 = vsel %vm3791_vm1, %v3782_v52, %v3783_v43  ;;  %v3786_v7 = vrot.slane %v5017_v25, 2  ;;  %v3884_v20 = vadd.f32 %v6156_v9, %v3845_v47 }
 0x214   : > { %3946 = vst [vmem:[%s6170_s21 + $0x98] sm:$0xff] %v3914_v46  ;;  %3949 = vst [vmem:[%s6170_s21 + $0xb0] sm:$0xff] %v3917_v60  ;;  %v3883_v27 = vadd.f32 %v6156_v9, %v3844_v14  ;;  %v3718_v15 = vadd.f32 %v6110_v54, %v3670_v10  ;;  %v3653_v42 = vrot.slane %v2325_v32, 1  ;;  %v3667_v34 = vsel %vm3662_vm0, %v3654_v6, %v3655_v57 }
 0x215   : > { %v3796_v22 = vsel %vm3791_vm1, %v3785_v13, %v3786_v7  ;;  %v3784_v23 = vrot.slane %v3404_v12, 2  ;;  %v4876_v36 = vpop.f32.mrb[60].mxu1  ;;  %v3916_v52 = vmax.f32 %v3884_v20, 0.0  ;;  %v3721_v28 = vadd.f32 %v6114_v63, %v3667_v34 }
 0x216   : > { %v3915_v41 = vmax.f32 %v3883_v27, 0.0  ;;  %v3847_v51 = vadd.f32 %v3799_v49, %v3718_v15  ;;  %v5020_v30 = vpop.f32.mrb[60].mxu0  ;;  %v2338_v33 = vpop.f32.mrb[61].mxu1  ;;  %v3668_v54 = vsel %vm3662_vm0, %v3653_v42, %v3654_v6  ;;  %v3669_v5 = vsel %vm3662_vm0, %v3652_v18, %v3653_v42 }
 0x217   : > { %v3797_v38 = vsel %vm3791_vm1, %v3784_v23, %v3785_v13  ;;  %v3798_v53 = vsel %vm3791_vm1, %v3783_v43, %v3784_v23  ;;  %v3417_v40 = vpop.f32.mrb[61].mxu0  ;;  %v4877_v44 = vpop.f32.mrb[62].mxu1  ;;  %3948 = vst [vmem:[%s6170_s21 + $0xa8] sm:$0xff] %v3916_v52  ;;  %v3850_v1 = vadd.f32 %v3796_v22, %v3721_v28  ;;  %v3719_v2 = vadd.f32 %v6116_v4, %v3669_v5 }
 0x218   : > { %3947 = vst [vmem:[%s6170_s21 + $0xa0] sm:$0xff] %v3915_v41  ;;  %v3886_v63 = vadd.f32 %v6156_v9, %v3847_v51  ;;  %v3720_v50 = vadd.f32 %v6120_v11, %v3668_v54  ;;  %v5021_v55 = vpop.f32.mrb[62].mxu0  ;;  %v2341_v16 = vpop.f32.mrb[63].mxu1  ;;  %v3658_v24 = vrot.slane %v4876_v36, 1  ;;  %v3789_v39 = vrot.slane %v5020_v30, 2 }
 0x219   : > { %v3656_v45 = vrot.slane %v2338_v33, 1  ;;  %v3787_v58 = vrot.slane %v3417_v40, 2  ;;  %v3420_v19 = vpop.f32.mrb[63].mxu0  ;;  %v3889_v61 = vadd.f32 %v6156_v9, %v3850_v1  ;;  %v3848_v3 = vadd.f32 %v3798_v53, %v3719_v2 }
 0x21a   : > { %v3918_v62 = vmax.f32 %v3886_v63, 0.0  ;;  %v3849_v56 = vadd.f32 %v3797_v38, %v3720_v50  ;;  %v3659_v11 = vrot.slane %v4877_v44, 1  ;;  %v3790_v25 = vrot.slane %v5021_v55, 2 }
 0x21b   : > { %v3666_v0 = vsel %vm3662_vm0, %v3655_v57, %v3656_v45  ;;  %v3795_v4 = vsel %vm3791_vm1, %v3786_v7, %v3787_v58  ;;  %v3921_v32 = vmax.f32 %v3889_v61, 0.0  ;;  %v3887_v6 = vadd.f32 %v6156_v9, %v3848_v3 }
 0x21c   : > { %3950 = vst [vmem:[%s6170_s21 + $0xb8] sm:$0xff] %v3918_v62  ;;  %v3888_v13 = vadd.f32 %v6156_v9, %v3849_v56  ;;  %v3722_v18 = vadd.f32 %v6118_v8, %v3666_v0  ;;  %v3663_v43 = vsel %vm3662_vm0, %v3658_v24, %v3659_v11  ;;  %v3694_v12 = vsel %vm3662_vm0, %v3659_v11, %v3628_v48 }
 0x21d   : > { %v3792_v46 = vsel %vm3791_vm1, %v3789_v39, %v3790_v25  ;;  %v3823_v60 = vsel %vm3791_vm1, %v3790_v25, %v3759_v59  ;;  %3953 = vst [vmem:[%s6170_s21 + $0xd0] sm:$0xff] %v3921_v32  ;;  %v3919_v14 = vmax.f32 %v3887_v6, 0.0  ;;  %v3725_v10 = vadd.f32 %v6122_v17, %v3663_v43 }
 0x21e   : > { %v3920_v47 = vmax.f32 %v3888_v13, 0.0  ;;  %v3851_v8 = vadd.f32 %v3795_v4, %v3722_v18  ;;  %v3726_v49 = vadd.f32 %v6126_v26, %v3694_v12  ;;  %v3657_v35 = vrot.slane %v2341_v16, 1 }
 0x21f   : > { %v3788_v57 = vrot.slane %v3420_v19, 2  ;;  %3951 = vst [vmem:[%s6170_s21 + $0xc0] sm:$0xff] %v3919_v14  ;;  %v3854_v7 = vadd.f32 %v3792_v46, %v3725_v10 }
 0x220   : > { %3952 = vst [vmem:[%s6170_s21 + $0xc8] sm:$0xff] %v3920_v47  ;;  %v3890_v48 = vadd.f32 %v6156_v9, %v3851_v8  ;;  %v3855_v37 = vadd.f32 %v3823_v60, %v3726_v49  ;;  %v3664_v59 = vsel %vm3662_vm0, %v3657_v35, %v3658_v24  ;;  %v3665_v27 = vsel %vm3662_vm0, %v3656_v45, %v3657_v35 }
 0x221   : > { %v3793_v17 = vsel %vm3791_vm1, %v3788_v57, %v3789_v39  ;;  %v3893_v20 = vadd.f32 %v6156_v9, %v3854_v7  ;;  %v3723_v15 = vadd.f32 %v6124_v21, %v3665_v27  ;;  %v3724_v42 = vadd.f32 %v6128_v29, %v3664_v59 }
 0x222   : > { %v3922_v26 = vmax.f32 %v3890_v48, 0.0  ;;  %v3894_v34 = vadd.f32 %v6156_v9, %v3855_v37  ;;  %v3794_v22 = vsel %vm3791_vm1, %v3787_v58, %v3788_v57 }
 0x223   : > { %v3925_v23 = vmax.f32 %v3893_v20, 0.0  ;;  %v3852_v36 = vadd.f32 %v3794_v22, %v3723_v15  ;;  %v3853_v41 = vadd.f32 %v3793_v17, %v3724_v42 }
 0x224   : > { %3954 = vst [vmem:[%s6170_s21 + $0xd8] sm:$0xff] %v3922_v26  ;;  %v3926_v52 = vmax.f32 %v3894_v34, 0.0 }
 0x225   : > { %3957 = vst [vmem:[%s6170_s21 + $0xf0] sm:$0xff] %v3925_v23  ;;  %v3891_v51 = vadd.f32 %v6156_v9, %v3852_v36  ;;  %v3892_v28 = vadd.f32 %v6156_v9, %v3853_v41 }
 0x226   : > { %3958 = vst [vmem:[%s6170_s21 + $0xf8] sm:$0xff] %v3926_v52 }
 0x227   : > { %v3923_v21 = vmax.f32 %v3891_v51, 0.0  ;;  %v3924_v30 = vmax.f32 %v3892_v28, 0.0 }
 0x229   : > { %3955 = vst [vmem:[%s6170_s21 + $0xe0] sm:$0xff] %v3923_v21  ;;  %3956 = vst [vmem:[%s6170_s21 + $0xe8] sm:$0xff] %v3924_v30 }
 0x22a PF: > { %s13_s16 = sadd.s32 1, %s5484_s16   ;;  %s6406_s12 = smov %s5476_s14 }
 0x22b   : > { %p10_p7 = scmp.ge.s32.totalorder %s13_s16, 6   ;;  %s6407_s13 = smov %s5480_s15 }
 0x22c   : > { %s6408_s14 = smov %s6411_s17  ;;  %s6409_s15 = smov %s6415_s18 }
 0x22d   :  { %12 = sbr.rel (!%p10_p7) target bundleno = 3 (0x3), region = 80 }

</bundles_post_ra>
